<compile_context>
chip_gen: v6e
topology: v6e:2x2x1
jax: 0.10.0
libtpu: 0.0.40
codegen_flags: <defaults>
</compile_context>

<pallas_src>
import functools

import jax
import jax.numpy as jnp
from jax import lax
from jax.experimental import pallas as pl
from jax.experimental.pallas import tpu as pltpu


# ----------------------------------------------------------------------------
# Helpers
# ----------------------------------------------------------------------------
def _round_up(x, m):
    return (x + m - 1) // m * m


def fold_conv_bn(w_hwio, bias, gamma, beta, mean, var, eps=1e-5):
    """Fold conv bias + inference-mode BN into the weights and a per-channel shift."""
    s = gamma * lax.rsqrt(var + eps)           # (Cout,)
    w_folded = w_hwio * s                      # scale per output channel
    shift = (bias - mean) * s + beta           # (Cout,)
    return w_folded, shift


# ----------------------------------------------------------------------------
# Fused kernel: conv1(3x3,s2)+bn1+relu -> conv2(3x3,s1)+bn2 + shortcut(1x1,s2)+bn_sc -> relu
#
# Flat layout used throughout:
#   Wp = Wo + 2; an (Ho, Wp) spatial grid is flattened row-major to L = Ho*Wp
#   rows.  Row m = i*Wp + j is a VALID output pixel for j < Wo and a junk
#   column for j in [Wo, Wp).  Every 3x3 tap then becomes a *contiguous*
#   row-slice of a flattened, spatially-padded source buffer, so each tap is
#   just   acc += dot(src[s : s+L, :], w_tap)   on the MXU.
# ----------------------------------------------------------------------------
def _fused_resblock_kernel(Ho, Wo, Cin, Cout,
                           x_ph_ref, w1_ref, s1_ref, w2_ref, wsc_ref, s2_ref,
                           o_ref, h1p_ref):
    Wp = Wo + 2
    L = Ho * Wp

    # ---- stage 1: conv1 (3x3, stride 2, pad 1) + bn1 + ReLU -----------------
    # x_ph_ref[0, p*2+q] is the flattened (Ho+2, Wp) parity phase (rows p::2,
    # cols q::2) of the zero-padded input; tap (kh, kw) of the stride-2 conv is
    # a contiguous slice of phase (kh%2, kw%2) starting at (kh//2)*Wp + kw//2.
    acc1 = jnp.zeros((L, Cout), jnp.float32)
    for kh in range(3):
        for kw in range(3):
            pidx = (kh % 2) * 2 + (kw % 2)
            s = (kh // 2) * Wp + (kw // 2)
            a = x_ph_ref[0, pidx, s:s + L, :]                     # (L, Cin) bf16
            acc1 = acc1 + jnp.dot(a, w1_ref[kh, kw],
                                  preferred_element_type=jnp.float32)
    h1 = jnp.maximum(acc1 + s1_ref[...], 0.0)                     # bn1 shift + ReLU

    # Zero the junk columns so the single contiguous store below also writes
    # the zero spatial padding that stage 2 relies on.
    col = lax.broadcasted_iota(jnp.int32, (L, 1), 0) % Wp
    h1 = jnp.where(col < Wo, h1, 0.0).astype(h1p_ref.dtype)

    # Padded conv1 activations, flat (Ho+2, Wp) layout, in VMEM scratch:
    # h1(i, j) must live at flat index (i+1)*Wp + (j+1) = m + Wp + 1.
    h1p_ref[...] = jnp.zeros_like(h1p_ref)
    h1p_ref[Wp + 1: Wp + 1 + L, :] = h1

    # ---- stage 2: conv2 (3x3, stride 1, pad 1) + bn2 + shortcut + ReLU ------
    acc2 = jnp.zeros((L, Cout), jnp.float32)
    for kh in range(3):
        for kw in range(3):
            s = kh * Wp + kw
            a = h1p_ref[s:s + L, :]                               # (L, Cout) bf16
            acc2 = acc2 + jnp.dot(a, w2_ref[kh, kw],
                                  preferred_element_type=jnp.float32)
    # shortcut: 1x1 stride-2 conv on x  ==  parity phase (odd, odd) at offset 0
    xs = x_ph_ref[0, 3, 0:L, :]                                   # (L, Cin) bf16
    acc2 = acc2 + jnp.dot(xs, wsc_ref[...],
                          preferred_element_type=jnp.float32)

    out = jnp.maximum(acc2 + s2_ref[...], 0.0)                    # (bn2+bn_sc) shift + ReLU
    o_ref[0] = out.astype(o_ref.dtype)


# ----------------------------------------------------------------------------
# ResBlockProjection forward (downsample=True, activation=ReLU), NCHW in/out.
# ----------------------------------------------------------------------------
def resblock_projection_forward(x_nchw, params):
    N, Cin, H, W = x_nchw.shape
    Cout = params["w1"].shape[-1]
    Ho = (H - 1) // 2 + 1
    Wo = (W - 1) // 2 + 1
    Wp = Wo + 2
    L = Ho * Wp
    F1 = (Ho + 2) * Wp                      # flat rows per parity phase
    F2 = _round_up(F1 + 2, 8)               # flat rows of the padded-h1 scratch

    # NCHW -> NHWC, bf16 once (matmul operand dtype) before any layout glue.
    x = jnp.transpose(x_nchw, (0, 2, 3, 1)).astype(jnp.bfloat16)

    # Zero-pad: 1 pixel top/left (the conv padding) and enough bottom/right so
    # every parity phase is exactly (Ho+2, Wo+2); flatten the phase spatial
    # dims.  This is ~1x input traffic of XLA glue (vs 9x for im2col).
    Hpad, Wpad = 2 * (Ho + 2), 2 * (Wo + 2)
    xp = jnp.pad(x, ((0, 0), (1, Hpad - H - 1), (1, Wpad - W - 1), (0, 0)))
    x_ph = jnp.stack([xp[:, p::2, q::2, :] for p in (0, 1) for q in (0, 1)],
                     axis=1)                                   # (N,4,Ho+2,Wp,Cin)
    x_ph = x_ph.reshape(N, 4, F1, Cin)

    # Fold conv bias + inference-mode BN into bf16 weights + f32 shifts.
    w1f, sh1 = fold_conv_bn(params["w1"], params["b1"], *params["bn1"])
    w2f, sh2 = fold_conv_bn(params["w2"], params["b2"], *params["bn2"])
    wscf, shsc = fold_conv_bn(params["w_sc"], params["b_sc"], *params["bn_sc"])
    w1b = w1f.astype(jnp.bfloat16)                             # (3,3,Cin,Cout)
    w2b = w2f.astype(jnp.bfloat16)                             # (3,3,Cout,Cout)
    wscb = wscf.reshape(Cin, Cout).astype(jnp.bfloat16)        # (Cin,Cout)
    s1 = sh1.reshape(1, Cout).astype(jnp.float32)
    s2 = (sh2 + shsc).reshape(1, Cout).astype(jnp.float32)

    # VMEM budget, sized to the actual blocks (safe on v5e/v6e/v7x).
    xph_blk = 4 * F1 * Cin * 2
    w_bytes = (w1b.size + w2b.size + wscb.size) * 2 + (s1.size + s2.size) * 4
    out_blk = L * Cout * 4
    acc_bytes = L * Cout * 4
    scratch_bytes = F2 * Cout * 2
    vmem_need = (2 * xph_blk + 2 * w_bytes + 2 * out_blk
                 + scratch_bytes + 6 * acc_bytes)
    vmem_limit = int(min(max(32 << 20, 2 * vmem_need), 96 << 20))

    flops = 2 * N * L * (9 * Cin * Cout + 9 * Cout * Cout + Cin * Cout)
    bytes_accessed = int(N * xph_blk + w_bytes + N * out_blk)

    kernel = functools.partial(_fused_resblock_kernel, Ho, Wo, Cin, Cout)

    out_flat = pl.pallas_call(
        kernel,
        out_shape=jax.ShapeDtypeStruct((N, L, Cout), jnp.float32),
        grid=(N,),
        in_specs=[
            pl.BlockSpec((1, 4, F1, Cin), lambda n: (n, 0, 0, 0)),    # phases: per image
            pl.BlockSpec((3, 3, Cin, Cout), lambda n: (0, 0, 0, 0)),  # w1: VMEM-resident
            pl.BlockSpec((1, Cout), lambda n: (0, 0)),                # bn1 shift
            pl.BlockSpec((3, 3, Cout, Cout), lambda n: (0, 0, 0, 0)), # w2: VMEM-resident
            pl.BlockSpec((Cin, Cout), lambda n: (0, 0)),              # shortcut weight
            pl.BlockSpec((1, Cout), lambda n: (0, 0)),                # bn2+bn_sc shift
        ],
        out_specs=pl.BlockSpec((1, L, Cout), lambda n: (n, 0, 0)),
        scratch_shapes=[pltpu.VMEM((F2, Cout), jnp.bfloat16)],        # padded h1
        compiler_params=pltpu.CompilerParams(
            dimension_semantics=("parallel",),
            vmem_limit_bytes=vmem_limit),
        cost_estimate=pl.CostEstimate(
            flops=flops, transcendentals=0, bytes_accessed=bytes_accessed),
    )(x_ph, w1b, s1, w2b, wscb, s2)

    # Strip the junk columns of the flat layout; return NCHW like the module.
    out = out_flat.reshape(N, Ho, Wp, Cout)[:, :, :Wo, :]
    return jnp.transpose(out, (0, 3, 1, 2))


# ----------------------------------------------------------------------------
# Pure-JAX reference (f32), NCHW in/out, for the correctness check.
# ----------------------------------------------------------------------------
def ref_forward(x_nchw, params):
    dn = ("NHWC", "HWIO", "NHWC")
    x = jnp.transpose(x_nchw, (0, 2, 3, 1))

    def bn(y, bn_params):
        gamma, beta, mean, var = bn_params
        return (y - mean) * lax.rsqrt(var + 1e-5) * gamma + beta

    sc = lax.conv_general_dilated(x, params["w_sc"], (2, 2), "VALID",
                                  dimension_numbers=dn) + params["b_sc"]
    sc = bn(sc, params["bn_sc"])

    h = lax.conv_general_dilated(x, params["w1"], (2, 2), [(1, 1), (1, 1)],
                                 dimension_numbers=dn) + params["b1"]
    h = jnp.maximum(bn(h, params["bn1"]), 0.0)

    h = lax.conv_general_dilated(h, params["w2"], (1, 1), [(1, 1), (1, 1)],
                                 dimension_numbers=dn) + params["b2"]
    h = bn(h, params["bn2"])
    out = jnp.maximum(h + sc, 0.0)
    return jnp.transpose(out, (0, 3, 1, 2))


# ----------------------------------------------------------------------------
if __name__ == "__main__":
    key = jax.random.PRNGKey(0)
    N, Cin, Cout, H, W = 2, 4, 8, 16, 16          # downsample=True -> 8x8 out

    ks = jax.random.split(key, 16)
    params = {
        # conv weights stored directly in HWIO layout (synthetic init)
        "w1":   jax.random.normal(ks[0], (3, 3, Cin, Cout), jnp.float32) * 0.1,
        "b1":   jax.random.normal(ks[1], (Cout,), jnp.float32) * 0.1,
        "w2":   jax.random.normal(ks[2], (3, 3, Cout, Cout), jnp.float32) * 0.1,
        "b2":   jax.random.normal(ks[3], (Cout,), jnp.float32) * 0.1,
        "w_sc": jax.random.normal(ks[4], (1, 1, Cin, Cout), jnp.float32) * 0.1,
        "b_sc": jax.random.normal(ks[5], (Cout,), jnp.float32) * 0.1,
        # BN: (gamma, beta, running_mean, running_var)
        "bn1": (1.0 + 0.1 * jax.random.normal(ks[6], (Cout,), jnp.float32),
                0.1 * jax.random.normal(ks[7], (Cout,), jnp.float32),
                0.1 * jax.random.normal(ks[8], (Cout,), jnp.float32),
                0.5 + jax.random.uniform(ks[9], (Cout,), jnp.float32)),
        "bn2": (1.0 + 0.1 * jax.random.normal(ks[10], (Cout,), jnp.float32),
                0.1 * jax.random.normal(ks[11], (Cout,), jnp.float32),
                0.1 * jax.random.normal(ks[12], (Cout,), jnp.float32),
                0.5 + jax.random.uniform(ks[13], (Cout,), jnp.float32)),
        "bn_sc": (jnp.ones((Cout,), jnp.float32),
                  jnp.zeros((Cout,), jnp.float32),
                  0.1 * jax.random.normal(ks[14], (Cout,), jnp.float32),
                  0.5 + jax.random.uniform(ks[15], (Cout,), jnp.float32)),
    }

    x = jax.random.normal(jax.random.PRNGKey(1), (N, Cin, H, W), jnp.float32)

    out = jax.jit(resblock_projection_forward)(x, params)
    out = jax.block_until_ready(out)

    ref = jax.block_until_ready(ref_forward(x, params))
    assert out.shape == (N, Cout, H // 2, W // 2), out.shape
    # bf16 matmul operands + bf16 h1 intermediate -> loosened tolerance vs f32 ref
    assert jnp.allclose(out, ref, atol=5e-2, rtol=5e-2), "mismatch vs reference"

    print("KERNEL_OK")
</pallas_src>

<mosaic_0001>
module attributes {stable_mosaic.version = 11 : i64} {
  func.func @_fused_resblock_kernel(%arg0: i32, %arg1: memref<1x4x100x4xbf16, #tpu.memory_space<vmem>>, %arg2: memref<3x3x4x8xbf16, #tpu.memory_space<vmem>>, %arg3: memref<1x8xf32, #tpu.memory_space<vmem>>, %arg4: memref<3x3x8x8xbf16, #tpu.memory_space<vmem>>, %arg5: memref<4x8xbf16, #tpu.memory_space<vmem>>, %arg6: memref<1x8xf32, #tpu.memory_space<vmem>>, %arg7: memref<1x80x8xf32, #tpu.memory_space<vmem>>, %arg8: memref<104x8xbf16, #tpu.memory_space<vmem>>) attributes {dimension_semantics = [#tpu.dimension_semantics<parallel>], iteration_bounds = array<i64: 2>, scalar_prefetch = 0 : i64, scratch_operands = 1 : i64, tpu.core_type = #tpu.core_type<tc>, window_params = [{transform_indices = @transform_0, window_bounds = array<i64: 1, 4, 100, 4>}, {pipeline_mode = #tpu.pipeline_mode<synchronous>, transform_indices = @transform_1, window_bounds = array<i64: 3, 3, 4, 8>}, {pipeline_mode = #tpu.pipeline_mode<synchronous>, transform_indices = @transform_2, window_bounds = array<i64: 1, 8>}, {pipeline_mode = #tpu.pipeline_mode<synchronous>, transform_indices = @transform_3, window_bounds = array<i64: 3, 3, 8, 8>}, {pipeline_mode = #tpu.pipeline_mode<synchronous>, transform_indices = @transform_4, window_bounds = array<i64: 4, 8>}, {pipeline_mode = #tpu.pipeline_mode<synchronous>, transform_indices = @transform_5, window_bounds = array<i64: 1, 8>}, {transform_indices = @transform_6, window_bounds = array<i64: 1, 80, 8>}]} {
    %cst = arith.constant 0.000000e+00 : f32
    %0 = vector.broadcast %cst : f32 to vector<80x8xf32>
    %c0 = arith.constant 0 : index
    %c0_0 = arith.constant 0 : index
    %c0_1 = arith.constant 0 : index
    %c0_2 = arith.constant 0 : index
    %1 = vector.load %arg1[%c0, %c0_0, %c0_1, %c0_2] : memref<1x4x100x4xbf16, #tpu.memory_space<vmem>>, vector<1x1x80x4xbf16>
    %2 = vector.shape_cast %1 : vector<1x1x80x4xbf16> to vector<80x4xbf16>
    %c0_3 = arith.constant 0 : index
    %c0_4 = arith.constant 0 : index
    %c0_5 = arith.constant 0 : index
    %c0_6 = arith.constant 0 : index
    %3 = vector.load %arg2[%c0_3, %c0_4, %c0_5, %c0_6] : memref<3x3x4x8xbf16, #tpu.memory_space<vmem>>, vector<1x1x4x8xbf16>
    %4 = vector.shape_cast %3 : vector<1x1x4x8xbf16> to vector<4x8xbf16>
    %cst_7 = arith.constant dense<0.000000e+00> : vector<80x8xf32>
    %5 = tpu.matmul %2, %4, %cst_7 {dimension_numbers = #tpu.dot_dimension_numbers<[1], [0], [0], [1], [0, 0, 1, 1], [], []>} : vector<80x4xbf16>, vector<4x8xbf16>, vector<80x8xf32> -> vector<80x8xf32>
    %6 = arith.addf %0, %5 : vector<80x8xf32>
    %c0_8 = arith.constant 0 : index
    %c1 = arith.constant 1 : index
    %c0_9 = arith.constant 0 : index
    %c0_10 = arith.constant 0 : index
    %7 = vector.load %arg1[%c0_8, %c1, %c0_9, %c0_10] : memref<1x4x100x4xbf16, #tpu.memory_space<vmem>>, vector<1x1x80x4xbf16>
    %8 = vector.shape_cast %7 : vector<1x1x80x4xbf16> to vector<80x4xbf16>
    %c0_11 = arith.constant 0 : index
    %c1_12 = arith.constant 1 : index
    %c0_13 = arith.constant 0 : index
    %c0_14 = arith.constant 0 : index
    %9 = vector.load %arg2[%c0_11, %c1_12, %c0_13, %c0_14] : memref<3x3x4x8xbf16, #tpu.memory_space<vmem>>, vector<1x1x4x8xbf16>
    %10 = vector.shape_cast %9 : vector<1x1x4x8xbf16> to vector<4x8xbf16>
    %cst_15 = arith.constant dense<0.000000e+00> : vector<80x8xf32>
    %11 = tpu.matmul %8, %10, %cst_15 {dimension_numbers = #tpu.dot_dimension_numbers<[1], [0], [0], [1], [0, 0, 1, 1], [], []>} : vector<80x4xbf16>, vector<4x8xbf16>, vector<80x8xf32> -> vector<80x8xf32>
    %12 = arith.addf %6, %11 : vector<80x8xf32>
    %c0_16 = arith.constant 0 : index
    %c0_17 = arith.constant 0 : index
    %c1_18 = arith.constant 1 : index
    %c0_19 = arith.constant 0 : index
    %13 = vector.load %arg1[%c0_16, %c0_17, %c1_18, %c0_19] : memref<1x4x100x4xbf16, #tpu.memory_space<vmem>>, vector<1x1x80x4xbf16>
    %14 = vector.shape_cast %13 : vector<1x1x80x4xbf16> to vector<80x4xbf16>
    %c0_20 = arith.constant 0 : index
    %c2 = arith.constant 2 : index
    %c0_21 = arith.constant 0 : index
    %c0_22 = arith.constant 0 : index
    %15 = vector.load %arg2[%c0_20, %c2, %c0_21, %c0_22] : memref<3x3x4x8xbf16, #tpu.memory_space<vmem>>, vector<1x1x4x8xbf16>
    %16 = vector.shape_cast %15 : vector<1x1x4x8xbf16> to vector<4x8xbf16>
    %cst_23 = arith.constant dense<0.000000e+00> : vector<80x8xf32>
    %17 = tpu.matmul %14, %16, %cst_23 {dimension_numbers = #tpu.dot_dimension_numbers<[1], [0], [0], [1], [0, 0, 1, 1], [], []>} : vector<80x4xbf16>, vector<4x8xbf16>, vector<80x8xf32> -> vector<80x8xf32>
    %18 = arith.addf %12, %17 : vector<80x8xf32>
    %c0_24 = arith.constant 0 : index
    %c2_25 = arith.constant 2 : index
    %c0_26 = arith.constant 0 : index
    %c0_27 = arith.constant 0 : index
    %19 = vector.load %arg1[%c0_24, %c2_25, %c0_26, %c0_27] : memref<1x4x100x4xbf16, #tpu.memory_space<vmem>>, vector<1x1x80x4xbf16>
    %20 = vector.shape_cast %19 : vector<1x1x80x4xbf16> to vector<80x4xbf16>
    %c1_28 = arith.constant 1 : index
    %c0_29 = arith.constant 0 : index
    %c0_30 = arith.constant 0 : index
    %c0_31 = arith.constant 0 : index
    %21 = vector.load %arg2[%c1_28, %c0_29, %c0_30, %c0_31] : memref<3x3x4x8xbf16, #tpu.memory_space<vmem>>, vector<1x1x4x8xbf16>
    %22 = vector.shape_cast %21 : vector<1x1x4x8xbf16> to vector<4x8xbf16>
    %cst_32 = arith.constant dense<0.000000e+00> : vector<80x8xf32>
    %23 = tpu.matmul %20, %22, %cst_32 {dimension_numbers = #tpu.dot_dimension_numbers<[1], [0], [0], [1], [0, 0, 1, 1], [], []>} : vector<80x4xbf16>, vector<4x8xbf16>, vector<80x8xf32> -> vector<80x8xf32>
    %24 = arith.addf %18, %23 : vector<80x8xf32>
    %c0_33 = arith.constant 0 : index
    %c3 = arith.constant 3 : index
    %c0_34 = arith.constant 0 : index
    %c0_35 = arith.constant 0 : index
    %25 = vector.load %arg1[%c0_33, %c3, %c0_34, %c0_35] : memref<1x4x100x4xbf16, #tpu.memory_space<vmem>>, vector<1x1x80x4xbf16>
    %26 = vector.shape_cast %25 : vector<1x1x80x4xbf16> to vector<80x4xbf16>
    %c1_36 = arith.constant 1 : index
    %c1_37 = arith.constant 1 : index
    %c0_38 = arith.constant 0 : index
    %c0_39 = arith.constant 0 : index
    %27 = vector.load %arg2[%c1_36, %c1_37, %c0_38, %c0_39] : memref<3x3x4x8xbf16, #tpu.memory_space<vmem>>, vector<1x1x4x8xbf16>
    %28 = vector.shape_cast %27 : vector<1x1x4x8xbf16> to vector<4x8xbf16>
    %cst_40 = arith.constant dense<0.000000e+00> : vector<80x8xf32>
    %29 = tpu.matmul %26, %28, %cst_40 {dimension_numbers = #tpu.dot_dimension_numbers<[1], [0], [0], [1], [0, 0, 1, 1], [], []>} : vector<80x4xbf16>, vector<4x8xbf16>, vector<80x8xf32> -> vector<80x8xf32>
    %30 = arith.addf %24, %29 : vector<80x8xf32>
    %c0_41 = arith.constant 0 : index
    %c2_42 = arith.constant 2 : index
    %c1_43 = arith.constant 1 : index
    %c0_44 = arith.constant 0 : index
    %31 = vector.load %arg1[%c0_41, %c2_42, %c1_43, %c0_44] : memref<1x4x100x4xbf16, #tpu.memory_space<vmem>>, vector<1x1x80x4xbf16>
    %32 = vector.shape_cast %31 : vector<1x1x80x4xbf16> to vector<80x4xbf16>
    %c1_45 = arith.constant 1 : index
    %c2_46 = arith.constant 2 : index
    %c0_47 = arith.constant 0 : index
    %c0_48 = arith.constant 0 : index
    %33 = vector.load %arg2[%c1_45, %c2_46, %c0_47, %c0_48] : memref<3x3x4x8xbf16, #tpu.memory_space<vmem>>, vector<1x1x4x8xbf16>
    %34 = vector.shape_cast %33 : vector<1x1x4x8xbf16> to vector<4x8xbf16>
    %cst_49 = arith.constant dense<0.000000e+00> : vector<80x8xf32>
    %35 = tpu.matmul %32, %34, %cst_49 {dimension_numbers = #tpu.dot_dimension_numbers<[1], [0], [0], [1], [0, 0, 1, 1], [], []>} : vector<80x4xbf16>, vector<4x8xbf16>, vector<80x8xf32> -> vector<80x8xf32>
    %36 = arith.addf %30, %35 : vector<80x8xf32>
    %c0_50 = arith.constant 0 : index
    %c0_51 = arith.constant 0 : index
    %c10 = arith.constant 10 : index
    %c0_52 = arith.constant 0 : index
    %37 = vector.load %arg1[%c0_50, %c0_51, %c10, %c0_52] : memref<1x4x100x4xbf16, #tpu.memory_space<vmem>>, vector<1x1x80x4xbf16>
    %38 = vector.shape_cast %37 : vector<1x1x80x4xbf16> to vector<80x4xbf16>
    %c2_53 = arith.constant 2 : index
    %c0_54 = arith.constant 0 : index
    %c0_55 = arith.constant 0 : index
    %c0_56 = arith.constant 0 : index
    %39 = vector.load %arg2[%c2_53, %c0_54, %c0_55, %c0_56] : memref<3x3x4x8xbf16, #tpu.memory_space<vmem>>, vector<1x1x4x8xbf16>
    %40 = vector.shape_cast %39 : vector<1x1x4x8xbf16> to vector<4x8xbf16>
    %cst_57 = arith.constant dense<0.000000e+00> : vector<80x8xf32>
    %41 = tpu.matmul %38, %40, %cst_57 {dimension_numbers = #tpu.dot_dimension_numbers<[1], [0], [0], [1], [0, 0, 1, 1], [], []>} : vector<80x4xbf16>, vector<4x8xbf16>, vector<80x8xf32> -> vector<80x8xf32>
    %42 = arith.addf %36, %41 : vector<80x8xf32>
    %c0_58 = arith.constant 0 : index
    %c1_59 = arith.constant 1 : index
    %c10_60 = arith.constant 10 : index
    %c0_61 = arith.constant 0 : index
    %43 = vector.load %arg1[%c0_58, %c1_59, %c10_60, %c0_61] : memref<1x4x100x4xbf16, #tpu.memory_space<vmem>>, vector<1x1x80x4xbf16>
    %44 = vector.shape_cast %43 : vector<1x1x80x4xbf16> to vector<80x4xbf16>
    %c2_62 = arith.constant 2 : index
    %c1_63 = arith.constant 1 : index
    %c0_64 = arith.constant 0 : index
    %c0_65 = arith.constant 0 : index
    %45 = vector.load %arg2[%c2_62, %c1_63, %c0_64, %c0_65] : memref<3x3x4x8xbf16, #tpu.memory_space<vmem>>, vector<1x1x4x8xbf16>
    %46 = vector.shape_cast %45 : vector<1x1x4x8xbf16> to vector<4x8xbf16>
    %cst_66 = arith.constant dense<0.000000e+00> : vector<80x8xf32>
    %47 = tpu.matmul %44, %46, %cst_66 {dimension_numbers = #tpu.dot_dimension_numbers<[1], [0], [0], [1], [0, 0, 1, 1], [], []>} : vector<80x4xbf16>, vector<4x8xbf16>, vector<80x8xf32> -> vector<80x8xf32>
    %48 = arith.addf %42, %47 : vector<80x8xf32>
    %c0_67 = arith.constant 0 : index
    %c0_68 = arith.constant 0 : index
    %c11 = arith.constant 11 : index
    %c0_69 = arith.constant 0 : index
    %49 = vector.load %arg1[%c0_67, %c0_68, %c11, %c0_69] : memref<1x4x100x4xbf16, #tpu.memory_space<vmem>>, vector<1x1x80x4xbf16>
    %50 = vector.shape_cast %49 : vector<1x1x80x4xbf16> to vector<80x4xbf16>
    %c2_70 = arith.constant 2 : index
    %c2_71 = arith.constant 2 : index
    %c0_72 = arith.constant 0 : index
    %c0_73 = arith.constant 0 : index
    %51 = vector.load %arg2[%c2_70, %c2_71, %c0_72, %c0_73] : memref<3x3x4x8xbf16, #tpu.memory_space<vmem>>, vector<1x1x4x8xbf16>
    %52 = vector.shape_cast %51 : vector<1x1x4x8xbf16> to vector<4x8xbf16>
    %cst_74 = arith.constant dense<0.000000e+00> : vector<80x8xf32>
    %53 = tpu.matmul %50, %52, %cst_74 {dimension_numbers = #tpu.dot_dimension_numbers<[1], [0], [0], [1], [0, 0, 1, 1], [], []>} : vector<80x4xbf16>, vector<4x8xbf16>, vector<80x8xf32> -> vector<80x8xf32>
    %54 = arith.addf %48, %53 : vector<80x8xf32>
    %c0_75 = arith.constant 0 : index
    %c0_76 = arith.constant 0 : index
    %55 = vector.load %arg3[%c0_75, %c0_76] : memref<1x8xf32, #tpu.memory_space<vmem>>, vector<1x8xf32>
    %56 = vector.broadcast %55 : vector<1x8xf32> to vector<80x8xf32>
    %57 = arith.addf %54, %56 : vector<80x8xf32>
    %cst_77 = arith.constant 0.000000e+00 : f32
    %58 = vector.broadcast %cst_77 : f32 to vector<80x8xf32>
    %59 = arith.maximumf %57, %58 : vector<80x8xf32>
    %60 = tpu.iota {dimensions = array<i32: 0>} : vector<80x1xi32>
    %c10_i32 = arith.constant 10 : i32
    %c0_i32 = arith.constant 0 : i32
    %61 = arith.cmpi eq, %c10_i32, %c0_i32 : i32
    %c1_i32 = arith.constant 1 : i32
    %62 = arith.select %61, %c1_i32, %c10_i32 : i32
    %63 = vector.broadcast %62 : i32 to vector<80x1xi32>
    %64 = arith.remsi %60, %63 : vector<80x1xi32>
    %c0_i32_78 = arith.constant 0 : i32
    %65 = vector.broadcast %c0_i32_78 : i32 to vector<80x1xi32>
    %66 = arith.cmpi ne, %64, %65 : vector<80x1xi32>
    %c0_i32_79 = arith.constant 0 : i32
    %67 = vector.broadcast %c0_i32_79 : i32 to vector<80x1xi32>
    %68 = arith.cmpi slt, %64, %67 : vector<80x1xi32>
    %c0_i32_80 = arith.constant 0 : i32
    %69 = arith.cmpi slt, %62, %c0_i32_80 : i32
    %70 = vector.broadcast %69 : i1 to vector<80x1xi1>
    %71 = vector.broadcast %70 : vector<80x1xi1> to vector<80x1xi1>
    %72 = arith.xori %68, %71 : vector<80x1xi1>
    %73 = arith.andi %72, %66 : vector<80x1xi1>
    %74 = vector.broadcast %62 : i32 to vector<80x1xi32>
    %75 = arith.addi %64, %74 : vector<80x1xi32>
    %76 = arith.select %73, %75, %64 : vector<80x1xi1>, vector<80x1xi32>
    %c8_i32 = arith.constant 8 : i32
    %77 = vector.broadcast %c8_i32 : i32 to vector<80x1xi32>
    %78 = arith.cmpi slt, %76, %77 : vector<80x1xi32>
    %cst_81 = arith.constant 0.000000e+00 : f32
    %79 = vector.shape_cast %78 : vector<80x1xi1> to vector<80x1xi1>
    %80 = vector.broadcast %79 : vector<80x1xi1> to vector<80x8xi1>
    %81 = vector.broadcast %cst_81 : f32 to vector<80x8xf32>
    %82 = arith.select %80, %59, %81 : vector<80x8xi1>, vector<80x8xf32>
    %83 = arith.truncf %82 : vector<80x8xf32> to vector<80x8xbf16>
    %cst_82 = arith.constant 0.000000e+00 : bf16
    %84 = vector.broadcast %cst_82 : bf16 to vector<104x8xbf16>
    %c0_83 = arith.constant 0 : index
    %c0_84 = arith.constant 0 : index
    %85 = vector.load %arg8[%c0_83, %c0_84] : memref<104x8xbf16, #tpu.memory_space<vmem>>, vector<104x8xbf16>
    tpu.vector_store %arg8[%c0_83, %c0_84], %84 {strides = array<i32>} : memref<104x8xbf16, #tpu.memory_space<vmem>>, vector<104x8xbf16>,
    %c11_85 = arith.constant 11 : index
    %c0_86 = arith.constant 0 : index
    %86 = vector.load %arg8[%c11_85, %c0_86] : memref<104x8xbf16, #tpu.memory_space<vmem>>, vector<80x8xbf16>
    tpu.vector_store %arg8[%c11_85, %c0_86], %83 {strides = array<i32>} : memref<104x8xbf16, #tpu.memory_space<vmem>>, vector<80x8xbf16>,
    %cst_87 = arith.constant 0.000000e+00 : f32
    %87 = vector.broadcast %cst_87 : f32 to vector<80x8xf32>
    %c0_88 = arith.constant 0 : index
    %c0_89 = arith.constant 0 : index
    %88 = vector.load %arg8[%c0_88, %c0_89] : memref<104x8xbf16, #tpu.memory_space<vmem>>, vector<80x8xbf16>
    %c0_90 = arith.constant 0 : index
    %c0_91 = arith.constant 0 : index
    %c0_92 = arith.constant 0 : index
    %c0_93 = arith.constant 0 : index
    %89 = vector.load %arg4[%c0_90, %c0_91, %c0_92, %c0_93] : memref<3x3x8x8xbf16, #tpu.memory_space<vmem>>, vector<1x1x8x8xbf16>
    %90 = vector.shape_cast %89 : vector<1x1x8x8xbf16> to vector<8x8xbf16>
    %cst_94 = arith.constant dense<0.000000e+00> : vector<80x8xf32>
    %91 = tpu.matmul %88, %90, %cst_94 {dimension_numbers = #tpu.dot_dimension_numbers<[1], [0], [0], [1], [0, 0, 1, 1], [], []>} : vector<80x8xbf16>, vector<8x8xbf16>, vector<80x8xf32> -> vector<80x8xf32>
    %92 = arith.addf %87, %91 : vector<80x8xf32>
    %c1_95 = arith.constant 1 : index
    %c0_96 = arith.constant 0 : index
    %93 = vector.load %arg8[%c1_95, %c0_96] : memref<104x8xbf16, #tpu.memory_space<vmem>>, vector<80x8xbf16>
    %c0_97 = arith.constant 0 : index
    %c1_98 = arith.constant 1 : index
    %c0_99 = arith.constant 0 : index
    %c0_100 = arith.constant 0 : index
    %94 = vector.load %arg4[%c0_97, %c1_98, %c0_99, %c0_100] : memref<3x3x8x8xbf16, #tpu.memory_space<vmem>>, vector<1x1x8x8xbf16>
    %95 = vector.shape_cast %94 : vector<1x1x8x8xbf16> to vector<8x8xbf16>
    %cst_101 = arith.constant dense<0.000000e+00> : vector<80x8xf32>
    %96 = tpu.matmul %93, %95, %cst_101 {dimension_numbers = #tpu.dot_dimension_numbers<[1], [0], [0], [1], [0, 0, 1, 1], [], []>} : vector<80x8xbf16>, vector<8x8xbf16>, vector<80x8xf32> -> vector<80x8xf32>
    %97 = arith.addf %92, %96 : vector<80x8xf32>
    %c2_102 = arith.constant 2 : index
    %c0_103 = arith.constant 0 : index
    %98 = vector.load %arg8[%c2_102, %c0_103] : memref<104x8xbf16, #tpu.memory_space<vmem>>, vector<80x8xbf16>
    %c0_104 = arith.constant 0 : index
    %c2_105 = arith.constant 2 : index
    %c0_106 = arith.constant 0 : index
    %c0_107 = arith.constant 0 : index
    %99 = vector.load %arg4[%c0_104, %c2_105, %c0_106, %c0_107] : memref<3x3x8x8xbf16, #tpu.memory_space<vmem>>, vector<1x1x8x8xbf16>
    %100 = vector.shape_cast %99 : vector<1x1x8x8xbf16> to vector<8x8xbf16>
    %cst_108 = arith.constant dense<0.000000e+00> : vector<80x8xf32>
    %101 = tpu.matmul %98, %100, %cst_108 {dimension_numbers = #tpu.dot_dimension_numbers<[1], [0], [0], [1], [0, 0, 1, 1], [], []>} : vector<80x8xbf16>, vector<8x8xbf16>, vector<80x8xf32> -> vector<80x8xf32>
    %102 = arith.addf %97, %101 : vector<80x8xf32>
    %c10_109 = arith.constant 10 : index
    %c0_110 = arith.constant 0 : index
    %103 = vector.load %arg8[%c10_109, %c0_110] : memref<104x8xbf16, #tpu.memory_space<vmem>>, vector<80x8xbf16>
    %c1_111 = arith.constant 1 : index
    %c0_112 = arith.constant 0 : index
    %c0_113 = arith.constant 0 : index
    %c0_114 = arith.constant 0 : index
    %104 = vector.load %arg4[%c1_111, %c0_112, %c0_113, %c0_114] : memref<3x3x8x8xbf16, #tpu.memory_space<vmem>>, vector<1x1x8x8xbf16>
    %105 = vector.shape_cast %104 : vector<1x1x8x8xbf16> to vector<8x8xbf16>
    %cst_115 = arith.constant dense<0.000000e+00> : vector<80x8xf32>
    %106 = tpu.matmul %103, %105, %cst_115 {dimension_numbers = #tpu.dot_dimension_numbers<[1], [0], [0], [1], [0, 0, 1, 1], [], []>} : vector<80x8xbf16>, vector<8x8xbf16>, vector<80x8xf32> -> vector<80x8xf32>
    %107 = arith.addf %102, %106 : vector<80x8xf32>
    %c11_116 = arith.constant 11 : index
    %c0_117 = arith.constant 0 : index
    %108 = vector.load %arg8[%c11_116, %c0_117] : memref<104x8xbf16, #tpu.memory_space<vmem>>, vector<80x8xbf16>
    %c1_118 = arith.constant 1 : index
    %c1_119 = arith.constant 1 : index
    %c0_120 = arith.constant 0 : index
    %c0_121 = arith.constant 0 : index
    %109 = vector.load %arg4[%c1_118, %c1_119, %c0_120, %c0_121] : memref<3x3x8x8xbf16, #tpu.memory_space<vmem>>, vector<1x1x8x8xbf16>
    %110 = vector.shape_cast %109 : vector<1x1x8x8xbf16> to vector<8x8xbf16>
    %cst_122 = arith.constant dense<0.000000e+00> : vector<80x8xf32>
    %111 = tpu.matmul %108, %110, %cst_122 {dimension_numbers = #tpu.dot_dimension_numbers<[1], [0], [0], [1], [0, 0, 1, 1], [], []>} : vector<80x8xbf16>, vector<8x8xbf16>, vector<80x8xf32> -> vector<80x8xf32>
    %112 = arith.addf %107, %111 : vector<80x8xf32>
    %c12 = arith.constant 12 : index
    %c0_123 = arith.constant 0 : index
    %113 = vector.load %arg8[%c12, %c0_123] : memref<104x8xbf16, #tpu.memory_space<vmem>>, vector<80x8xbf16>
    %c1_124 = arith.constant 1 : index
    %c2_125 = arith.constant 2 : index
    %c0_126 = arith.constant 0 : index
    %c0_127 = arith.constant 0 : index
    %114 = vector.load %arg4[%c1_124, %c2_125, %c0_126, %c0_127] : memref<3x3x8x8xbf16, #tpu.memory_space<vmem>>, vector<1x1x8x8xbf16>
    %115 = vector.shape_cast %114 : vector<1x1x8x8xbf16> to vector<8x8xbf16>
    %cst_128 = arith.constant dense<0.000000e+00> : vector<80x8xf32>
    %116 = tpu.matmul %113, %115, %cst_128 {dimension_numbers = #tpu.dot_dimension_numbers<[1], [0], [0], [1], [0, 0, 1, 1], [], []>} : vector<80x8xbf16>, vector<8x8xbf16>, vector<80x8xf32> -> vector<80x8xf32>
    %117 = arith.addf %112, %116 : vector<80x8xf32>
    %c20 = arith.constant 20 : index
    %c0_129 = arith.constant 0 : index
    %118 = vector.load %arg8[%c20, %c0_129] : memref<104x8xbf16, #tpu.memory_space<vmem>>, vector<80x8xbf16>
    %c2_130 = arith.constant 2 : index
    %c0_131 = arith.constant 0 : index
    %c0_132 = arith.constant 0 : index
    %c0_133 = arith.constant 0 : index
    %119 = vector.load %arg4[%c2_130, %c0_131, %c0_132, %c0_133] : memref<3x3x8x8xbf16, #tpu.memory_space<vmem>>, vector<1x1x8x8xbf16>
    %120 = vector.shape_cast %119 : vector<1x1x8x8xbf16> to vector<8x8xbf16>
    %cst_134 = arith.constant dense<0.000000e+00> : vector<80x8xf32>
    %121 = tpu.matmul %118, %120, %cst_134 {dimension_numbers = #tpu.dot_dimension_numbers<[1], [0], [0], [1], [0, 0, 1, 1], [], []>} : vector<80x8xbf16>, vector<8x8xbf16>, vector<80x8xf32> -> vector<80x8xf32>
    %122 = arith.addf %117, %121 : vector<80x8xf32>
    %c21 = arith.constant 21 : index
    %c0_135 = arith.constant 0 : index
    %123 = vector.load %arg8[%c21, %c0_135] : memref<104x8xbf16, #tpu.memory_space<vmem>>, vector<80x8xbf16>
    %c2_136 = arith.constant 2 : index
    %c1_137 = arith.constant 1 : index
    %c0_138 = arith.constant 0 : index
    %c0_139 = arith.constant 0 : index
    %124 = vector.load %arg4[%c2_136, %c1_137, %c0_138, %c0_139] : memref<3x3x8x8xbf16, #tpu.memory_space<vmem>>, vector<1x1x8x8xbf16>
    %125 = vector.shape_cast %124 : vector<1x1x8x8xbf16> to vector<8x8xbf16>
    %cst_140 = arith.constant dense<0.000000e+00> : vector<80x8xf32>
    %126 = tpu.matmul %123, %125, %cst_140 {dimension_numbers = #tpu.dot_dimension_numbers<[1], [0], [0], [1], [0, 0, 1, 1], [], []>} : vector<80x8xbf16>, vector<8x8xbf16>, vector<80x8xf32> -> vector<80x8xf32>
    %127 = arith.addf %122, %126 : vector<80x8xf32>
    %c22 = arith.constant 22 : index
    %c0_141 = arith.constant 0 : index
    %128 = vector.load %arg8[%c22, %c0_141] : memref<104x8xbf16, #tpu.memory_space<vmem>>, vector<80x8xbf16>
    %c2_142 = arith.constant 2 : index
    %c2_143 = arith.constant 2 : index
    %c0_144 = arith.constant 0 : index
    %c0_145 = arith.constant 0 : index
    %129 = vector.load %arg4[%c2_142, %c2_143, %c0_144, %c0_145] : memref<3x3x8x8xbf16, #tpu.memory_space<vmem>>, vector<1x1x8x8xbf16>
    %130 = vector.shape_cast %129 : vector<1x1x8x8xbf16> to vector<8x8xbf16>
    %cst_146 = arith.constant dense<0.000000e+00> : vector<80x8xf32>
    %131 = tpu.matmul %128, %130, %cst_146 {dimension_numbers = #tpu.dot_dimension_numbers<[1], [0], [0], [1], [0, 0, 1, 1], [], []>} : vector<80x8xbf16>, vector<8x8xbf16>, vector<80x8xf32> -> vector<80x8xf32>
    %132 = arith.addf %127, %131 : vector<80x8xf32>
    %c0_147 = arith.constant 0 : index
    %c3_148 = arith.constant 3 : index
    %c0_149 = arith.constant 0 : index
    %c0_150 = arith.constant 0 : index
    %133 = vector.load %arg1[%c0_147, %c3_148, %c0_149, %c0_150] : memref<1x4x100x4xbf16, #tpu.memory_space<vmem>>, vector<1x1x80x4xbf16>
    %134 = vector.shape_cast %133 : vector<1x1x80x4xbf16> to vector<80x4xbf16>
    %c0_151 = arith.constant 0 : index
    %c0_152 = arith.constant 0 : index
    %135 = vector.load %arg5[%c0_151, %c0_152] : memref<4x8xbf16, #tpu.memory_space<vmem>>, vector<4x8xbf16>
    %cst_153 = arith.constant dense<0.000000e+00> : vector<80x8xf32>
    %136 = tpu.matmul %134, %135, %cst_153 {dimension_numbers = #tpu.dot_dimension_numbers<[1], [0], [0], [1], [0, 0, 1, 1], [], []>} : vector<80x4xbf16>, vector<4x8xbf16>, vector<80x8xf32> -> vector<80x8xf32>
    %137 = arith.addf %132, %136 : vector<80x8xf32>
    %c0_154 = arith.constant 0 : index
    %c0_155 = arith.constant 0 : index
    %138 = vector.load %arg6[%c0_154, %c0_155] : memref<1x8xf32, #tpu.memory_space<vmem>>, vector<1x8xf32>
    %139 = vector.broadcast %138 : vector<1x8xf32> to vector<80x8xf32>
    %140 = arith.addf %137, %139 : vector<80x8xf32>
    %cst_156 = arith.constant 0.000000e+00 : f32
    %141 = vector.broadcast %cst_156 : f32 to vector<80x8xf32>
    %142 = arith.maximumf %140, %141 : vector<80x8xf32>
    %c0_157 = arith.constant 0 : index
    %c0_158 = arith.constant 0 : index
    %c0_159 = arith.constant 0 : index
    %143 = vector.load %arg7[%c0_157, %c0_158, %c0_159] : memref<1x80x8xf32, #tpu.memory_space<vmem>>, vector<1x80x8xf32>
    %144 = vector.shape_cast %143 : vector<1x80x8xf32> to vector<80x8xf32>
    %145 = vector.shape_cast %142 : vector<80x8xf32> to vector<1x80x8xf32>
    tpu.vector_store %arg7[%c0_157, %c0_158, %c0_159], %145 {strides = array<i32>} : memref<1x80x8xf32, #tpu.memory_space<vmem>>, vector<1x80x8xf32>,
    return
  }
  func.func @transform_0(%arg0: i32) -> (i32, i32, i32, i32) {
    %c0_i32 = arith.constant 0 : i32
    %c0_i32_0 = arith.constant 0 : i32
    %c0_i32_1 = arith.constant 0 : i32
    %c0_i32_2 = arith.constant 0 : i32
    return %arg0, %c0_i32, %c0_i32_0, %c0_i32_1 : i32, i32, i32, i32
  }
  func.func @transform_1(%arg0: i32) -> (i32, i32, i32, i32) {
    %c0_i32 = arith.constant 0 : i32
    %c0_i32_0 = arith.constant 0 : i32
    %c0_i32_1 = arith.constant 0 : i32
    %c0_i32_2 = arith.constant 0 : i32
    %c0_i32_3 = arith.constant 0 : i32
    return %c0_i32, %c0_i32_0, %c0_i32_1, %c0_i32_2 : i32, i32, i32, i32
  }
  func.func @transform_2(%arg0: i32) -> (i32, i32) {
    %c0_i32 = arith.constant 0 : i32
    %c0_i32_0 = arith.constant 0 : i32
    %c0_i32_1 = arith.constant 0 : i32
    return %c0_i32, %c0_i32_0 : i32, i32
  }
  func.func @transform_3(%arg0: i32) -> (i32, i32, i32, i32) {
    %c0_i32 = arith.constant 0 : i32
    %c0_i32_0 = arith.constant 0 : i32
    %c0_i32_1 = arith.constant 0 : i32
    %c0_i32_2 = arith.constant 0 : i32
    %c0_i32_3 = arith.constant 0 : i32
    return %c0_i32, %c0_i32_0, %c0_i32_1, %c0_i32_2 : i32, i32, i32, i32
  }
  func.func @transform_4(%arg0: i32) -> (i32, i32) {
    %c0_i32 = arith.constant 0 : i32
    %c0_i32_0 = arith.constant 0 : i32
    %c0_i32_1 = arith.constant 0 : i32
    return %c0_i32, %c0_i32_0 : i32, i32
  }
  func.func @transform_5(%arg0: i32) -> (i32, i32) {
    %c0_i32 = arith.constant 0 : i32
    %c0_i32_0 = arith.constant 0 : i32
    %c0_i32_1 = arith.constant 0 : i32
    return %c0_i32, %c0_i32_0 : i32, i32
  }
  func.func @transform_6(%arg0: i32) -> (i32, i32, i32) {
    %c0_i32 = arith.constant 0 : i32
    %c0_i32_0 = arith.constant 0 : i32
    %c0_i32_1 = arith.constant 0 : i32
    return %arg0, %c0_i32, %c0_i32_0 : i32, i32, i32
  }
}

</mosaic_0001>

<bundles_post_ra>
// kernel: resblock_projection_forward.1
= control target key start
LH: loop header
LB: loop body
LE: loop exit
PB: predicated region body
PF: predicated region fallthrough
CT: control target
= control target key end

     0   :  { %s4484_s21 = smov 0   ;;  %s5732_s0 = inlined_call_operand.vmem [shape: bf16[2,4,100,4], index: 0, kind: input, shape index: {}]   ;;  %s5733_s1 = inlined_call_operand.vmem [shape: bf16[3,3,4,8], index: 1, kind: input, shape index: {}]   ;;  %s5734_s2 = inlined_call_operand.vmem [shape: f32[1,8], index: 2, kind: input, shape index: {}]   ;;  %s5735_s3 = inlined_call_operand.vmem [shape: bf16[3,3,8,8], index: 3, kind: input, shape index: {}]   ;;  %s5736_s4 = inlined_call_operand.vmem [shape: bf16[4,8], index: 4, kind: input, shape index: {}]   ;;  %s5737_s5 = inlined_call_operand.vmem [shape: f32[1,8], index: 5, kind: input, shape index: {}]   ;;  %s5738_s6 = inlined_call_operand.vmem [shape: f32[2,80,8], index: 6, kind: output, shape index: {}]  }
   0x1 LB: > { %s3522_s22 = sadd.s32 4294967295, %s4444_s21   ;;  %p3526_p0 = scmp.ge.s32.totalorder %s4444_s21, 1  ;;  %s4444_s21 = sphi %s4484_s21, %s16_s21  }
   0x2   : > { %p212_p1 = scmp.lt.s32.totalorder %s4444_s21, 3 }
   0x4   : > { %p213_p2 = pnand %p3526_p0, %p212_p1 }
   0x5   : > { %p242_p3 = scmp.lt.s32.totalorder (!%p213_p2), %s3522_s22, 1 }
   0x6   : > { %216 = sbr.rel (%p213_p2) target bundleno = 790 (0x316), region = 44 }
   0xb   : > { %v3539_v0 = vld [vmem:[%s5733_s1 + $0x2] sm:$0x3]  ;;  %vm5740_vm0 = vcmask 1041408   ;;  %v4446_v1 = vmov 0.0   ;;  %s5837_s22 = smov (!%p242_p3, %s3522_s22), 1  ;;  %vm5744_vm1 = vmmov 0  }
   0xc   : > { %3913 = vmatprep.subr.bf16.mxu0 %v4446_v1  ;;  %4331 = vmatprep.subr.bf16.mxu1 %v4446_v1  ;;  %v320_v2 = vsel %vm5740_vm0, %v3539_v0, 0  ;;  %s4333_s25 = smul.u32 208, %s5837_s22  ;;  %v3560_v3 = vld [vmem:[%s5733_s1 + $0x4] sm:$0x3]  ;;  %v263_v4 = vld [vmem:[%s5733_s1] sm:$0x3] }
   0xd   : > { %3914 = vmatpush3.bf16.msra.mxu0 %v320_v2  ;;  %4332 = vmatpush3.bf16.msra.mxu1 %v320_v2  ;;  %vm5739_vm2 = vcmask 31744   ;;  %v613_v6 = vsel %vm5740_vm0, %v3560_v3, 0  ;;  %v436_v8 = vsel %vm5740_vm0, %v263_v4, 0  ;;  %v3582_v14 = vld [vmem:[%s5733_s1 + $0x6] sm:$0x3]  ;;  %vm5742_vm4 = vcmask 1046528  }
   0xe   : > { %3915 = vmatprep.mubr.msk.bf16.mxu0 %vm5744_vm1, %v4446_v1  ;;  %3927 = vmatprep.mubr.msk.bf16.mxu1 %vm5744_vm1, %v4446_v1  ;;  %s4516_s8 = scalar_lea.vmem %s5732_s0, %s4333_s25  ;;  %v752_v20 = vsel %vm5740_vm0, %v3582_v14, 0  ;;  %vm5743_vm3 = vsmask.f32 7424  ;;  %v3603_v24 = vld [vmem:[%s5733_s1 + $0x8] sm:$0x3]  ;;  %vm5746_vm6 = vcmask 60416  }
   0xf   : > { %3957 = vmatprep.subr.bf16.mxu0 %v4446_v1  ;;  %3935 = vmatprep.subr.bf16.mxu1 %v4446_v1  ;;  %v4366_v5 = vld [vmem:[%s4516_s8 + $0x34] sm:$0xff]   ;;  %v4367_v7 = vld [vmem:[%s4516_s8 + $0x4c] sm:$0xff]   ;;  %v4368_v9 = vld [vmem:[%s4516_s8 + $0x3c] sm:$0xff]   ;;  %v891_v29 = vsel %vm5740_vm0, %v3603_v24, 0  ;;  %vm5741_vm5 = vsmask.f32 6400 }
  0x10   : > { %3916 = vmatmul.mubr.msk.bf16.vlgmr.msra.gmra.mxu0 %vm5739_vm2, %v4366_v5  ;;  %3928 = vmatmul.mubr.msk.bf16.vlgmr.msra.gmra.mxu1 %vm5739_vm2, %v4367_v7  ;;  %v4369_v10 = vld [vmem:[%s4516_s8 + $0x54] sm:$0xff]   ;;  %v4373_v11 = vld [vmem:[%s4516_s8] sm:$0xff]   ;;  %v4374_v12 = vld [vmem:[%s4516_s8 + $0x8] sm:$0xff]   ;;  %vm5747_vm7 = vcmask 1043456  }
  0x11   : > { %3958 = vmatpush3.bf16.msra.mxu0 %v613_v6  ;;  %3936 = vmatpush3.bf16.msra.mxu1 %v436_v8  ;;  %v556_v13 = vshll.u32 %v4373_v11, 16  ;;  %v4370_v15 = vld [vmem:[%s4516_s8 + $0x44] sm:$0xff]   ;;  %v554_v17 = vshrl.u32 %v4373_v11, 16  ;;  %v561_v19 = vshll.u32 %v4374_v12, 16  ;;  %v4376_v23 = vld [vmem:[%s4516_s8 + $0x10] sm:$0xff]   ;;  %v565_v27 = vshrl.u32 %v4374_v12, 16 }
  0x12   : > { %3919 = vmatprep.mubr.msk.bf16.mxu0 %vm5744_vm1, %v4446_v1  ;;  %3931 = vmatprep.mubr.msk.bf16.mxu1 %vm5744_vm1, %v4446_v1  ;;  %v4371_v16 = vld [vmem:[%s4516_s8] sm:$0xff]   ;;  %v4372_v25 = vld [vmem:[%s4516_s8 + $0x8] sm:$0xff]   ;;  %v569_v28 = vshll.u32 %v4376_v23, 16  ;;  %v4378_v32 = vld [vmem:[%s4516_s8 + $0x18] sm:$0xff]   ;;  %v573_v35 = vshrl.u32 %v4376_v23, 16 }
  0x13   : > { %3979 = vmatprep.subr.bf16.mxu1 %v4446_v1  ;;  %4001 = vmatprep.subr.bf16.mxu0 %v4446_v1  ;;  %v558_v18 = vrot.slane %v556_v13, 1  ;;  %v563_v22 = vrot.slane %v561_v19, 1  ;;  %v4375_v33 = vld [vmem:[%s4516_s8 + $0x10] sm:$0xff]   ;;  %v577_v36 = vshll.u32 %v4378_v32, 16  ;;  %v4380_v39 = vld [vmem:[%s4516_s8 + $0x20] sm:$0xff]   ;;  %v4377_v40 = vld [vmem:[%s4516_s8 + $0x18] sm:$0xff]  }
  0x14   : > { %v571_v31 = vrot.slane %v569_v28, 1  ;;  %v581_v42 = vshrl.u32 %v4378_v32, 16  ;;  %v585_v43 = vshll.u32 %v4380_v39, 16  ;;  %v4381_v46 = vld [vmem:[%s4516_s8 + $0x28] ss:$0 sps:$4 sm:$0x11]  }
  0x15   : > { %v559_v21 = vor.u32 %v558_v18, %v554_v17  ;;  %v567_v30 = vor.u32 %v565_v27, %v563_v22  ;;  %v579_v38 = vrot.slane %v577_v36, 1  ;;  %v4379_v47 = vld [vmem:[%s4516_s8 + $0x20] sm:$0xff]   ;;  %v589_v49 = vshrl.u32 %v4380_v39, 16  ;;  %v3625_v53 = vld [vmem:[%s5733_s1 + $0xa] sm:$0x3]  ;;  %v4383_v59 = vld [vmem:[%s4516_s8 + $0x70] sm:$0xff]  }
  0x16   : > { %v575_v37 = vor.u32 %v573_v35, %v571_v31  ;;  %v587_v45 = vrot.slane %v585_v43, 1  ;;  %v593_v50 = vshll.u32 %v4381_v46, 16  ;;  %v4382_v55 = vld [vmem:[%s4516_s8 + $0x68] sm:$0xff]   ;;  %v1077_v56 = vsel %vm5740_vm0, %v3625_v53, 0  ;;  %v4384_v58 = vld [vmem:[%s4516_s8 + $0x9c] sm:$0xff]   ;;  %v4393_v3 = vld [vmem:[%s4516_s8 + $0x70] sm:$0xff]  }
  0x17   : > { %v564_v26 = vsel %vm5743_vm3, %v559_v21, %v563_v22  ;;  %v572_v34 = vsel %vm5743_vm3, %v567_v30, %v571_v31  ;;  %v583_v44 = vor.u32 %v581_v42, %v579_v38  ;;  %v3637_v57 = vld [vmem:[%s5733_s1 + $0xc] sm:$0x3]  ;;  %v4386_v61 = vld [vmem:[%s4516_s8 + $0xa4] sm:$0xff]   ;;  %v4385_v62 = vld [vmem:[%s4516_s8 + $0x78] sm:$0xff]   ;;  %v1029_v18 = vshrl.u32 %v4393_v3, 16 }
  0x18   : > { %3920 = vmatmul.mubr.msk.bf16.gmra.mxu0 %vm5739_vm2, %v4368_v9  ;;  %3932 = vmatmul.mubr.msk.bf16.gmra.mxu1 %vm5739_vm2, %v4369_v10  ;;  %v580_v41 = vsel %vm5743_vm3, %v575_v37, %v579_v38  ;;  %v591_v51 = vor.u32 %v589_v49, %v587_v45  ;;  %v595_v52 = vrot.slane %v593_v50, 1  ;;  %v1231_v60 = vsel %vm5740_vm0, %v3637_v57, 0  ;;  %v4388_v63 = vld [vmem:[%s4516_s8 + $0xac] sm:$0xff]   ;;  %v4387_v0 = vld [vmem:[%s4516_s8 + $0x80] sm:$0xff]   ;;  %v4390_v5 = vld [vmem:[%s4516_s8 + $0xb4] sm:$0xff]  }
  0x19   : > { %3923 = vmatprep.mubr.msk.bf16.mxu0 %vm5744_vm1, %v4446_v1  ;;  %3937 = vmatprep.mubr.msk.bf16.mxu1 %vm5744_vm1, %v4446_v1  ;;  %v588_v48 = vsel %vm5743_vm3, %v583_v44, %v587_v45  ;;  %v4392_v2 = vld [vmem:[%s4516_s8 + $0x68] sm:$0xff]   ;;  %v1025_v9 = vshll.u32 %v4393_v3, 16  ;;  %v4394_v12 = vld [vmem:[%s4516_s8 + $0x78] sm:$0xff]   ;;  %v4401_v45 = vld [vmem:[%s4516_s8 + $0x90] ss:$0 sps:$4 sm:$0x11]  }
  0x1a   : > { %v596_v54 = vsel %vm5743_vm3, %v591_v51, %v595_v52  ;;  %v1020_v4 = vshll.u32 %v4392_v2, 16  ;;  %v4389_v6 = vld [vmem:[%s4516_s8 + $0x88] sm:$0xff]   ;;  %v1018_v7 = vshrl.u32 %v4392_v2, 16  ;;  %v4391_v13 = vld [vmem:[%s4516_s8 + $0xbc] sm:$0xff]   ;;  %v1033_v19 = vshll.u32 %v4394_v12, 16  ;;  %v4674_v28 = vld [vmem:[%s4516_s8 + $0x14] sm:$0xff]  }
  0x1b   : > { %v1027_v11 = vrot.slane %v1025_v9, 1  ;;  %v3660_v14 = vld [vmem:[%s5733_s1 + $0xe] sm:$0x3]  ;;  %v1037_v31 = vshrl.u32 %v4394_v12, 16  ;;  %v4689_v38 = vld [vmem:[%s4516_s8 + $0x1c] sm:$0xff]   ;;  %v1057_v50 = vshll.u32 %v4401_v45, 16 }
  0x1c   : > { %v1022_v8 = vrot.slane %v1020_v4, 1  ;;  %v1035_v24 = vrot.slane %v1033_v19, 1  ;;  %v4399_v36 = vld [vmem:[%s4516_s8 + $0x88] sm:$0xff]   ;;  %v1209_v42 = vrot.slane %v4689_v38, 1  ;;  %v4404_v57 = vld [vmem:[%s4516_s8 + $0x38] sm:$0xfe]  }
  0x1d   : > { %v1031_v23 = vor.u32 %v1029_v18, %v1027_v11  ;;  %v1053_v49 = vshrl.u32 %v4399_v36, 16  ;;  %v1059_v53 = vrot.slane %v1057_v50, 1  ;;  %v4406_v9 = vld [vmem:[%s4516_s8 + $0x48] sm:$0xff]   ;;  %v1494_v12 = vshrl.u32 %v4674_v28, 16  ;;  %v4407_v19 = vld [vmem:[%s4516_s8 + $0x50] sm:$0xff]  }
  0x1e   : > { %v1023_v10 = vor.u32 %v1022_v8, %v1018_v7 }
  0x20   : > { %3924 = vmatmul.mubr.msk.bf16.gmra.mxu0 %vm5739_vm2, %v4370_v15  ;;  %3938 = vmatmul.mubr.msk.bf16.vlgmr.msra.gmra.mxu1 %vm5739_vm2, %v4371_v16  ;;  %v4652_v15 = vld [vmem:[%s4516_s8 + $0x4] sm:$0xfe]   ;;  %v4655_v16 = vld [vmem:[%s4516_s8 + $0xc] sm:$0xff]   ;;  %v1028_v17 = vsel %vm5743_vm3, %v1023_v10, %v1027_v11 }
  0x21   : > { %3959 = vmatprep.mubr.msk.bf16.mxu0 %vm5744_vm1, %v4446_v1  ;;  %3980 = vmatpush3.bf16.msra.mxu1 %v752_v20  ;;  %v1384_v20 = vsel %vm5740_vm0, %v3660_v14, 0  ;;  %v1204_v21 = vrot.slane %v4652_v15, 1  ;;  %v1205_v22 = vrot.slane %v4655_v16, 1  ;;  %v1360_v14 = vrot.slane %v4406_v9, 1 }
  0x22   : > { %3941 = vmatprep.mubr.msk.bf16.mxu1 %vm5744_vm1, %v4446_v1  ;;  %4023 = vmatprep.subr.bf16.mxu1 %v4446_v1 }
  0x23   : > { %v1206_v27 = vsel %vm5742_vm4, %v1204_v21, %v1205_v22  ;;  %v1503_v21 = vshrl.u32 %v4689_v38, 16 }
  0x28   : > { %3960 = vmatmul.mubr.msk.bf16.vlgmr.msra.gmra.mxu0 %vm5739_vm2, %v564_v26  ;;  %3942 = vmatmul.mubr.msk.bf16.gmra.mxu1 %vm5739_vm2, %v4372_v25  ;;  %v4397_v25 = vld [vmem:[%s4516_s8 + $0x80] sm:$0xff]   ;;  %v3672_v26 = vld [vmem:[%s5733_s1 + $0x10] sm:$0x3] }
  0x29   : > { %4002 = vmatpush3.bf16.msra.mxu0 %v891_v29  ;;  %3945 = vmatprep.mubr.msk.bf16.mxu1 %vm5744_vm1, %v4446_v1  ;;  %v1036_v29 = vsel %vm5743_vm3, %v1031_v23, %v1035_v24  ;;  %v1545_v30 = vsel %vm5740_vm0, %v3672_v26, 0  ;;  %v1041_v32 = vshll.u32 %v4397_v25, 16  ;;  %v1362_v23 = vrot.slane %v4407_v19, 1 }
  0x2a   : > { %3963 = vmatprep.mubr.msk.bf16.mxu0 %vm5744_vm1, %v4446_v1  ;;  %4045 = vmatprep.subr.bf16.mxu0 %v4446_v1 }
  0x2b   : > { %v1043_v35 = vrot.slane %v1041_v32, 1 }
  0x30   : > { %3964 = vmatmul.mubr.msk.bf16.gmra.mxu0 %vm5739_vm2, %v572_v34  ;;  %3946 = vmatmul.mubr.msk.bf16.gmra.mxu1 %vm5739_vm2, %v4375_v33  ;;  %v1207_v33 = vrot.slane %v4674_v28, 1  ;;  %v1039_v34 = vor.u32 %v1037_v31, %v1035_v24 }
  0x31   : > { %3967 = vmatprep.mubr.msk.bf16.mxu0 %vm5744_vm1, %v4446_v1  ;;  %3949 = vmatprep.mubr.msk.bf16.mxu1 %vm5744_vm1, %v4446_v1 }
  0x32   : > { %v1208_v37 = vsel %vm5742_vm4, %v1205_v22, %v1207_v33  ;;  %v1044_v39 = vsel %vm5743_vm3, %v1039_v34, %v1043_v35  ;;  %v1210_v46 = vsel %vm5742_vm4, %v1207_v33, %v1209_v42  ;;  %v1506_v22 = vshll.u32 %v4689_v38, 16  ;;  %v4409_v38 = vld [vmem:[%s4516_s8 + $0x60] ss:$0 sps:$4 sm:$0x11]  }
  0x34   : > { %v1508_v26 = vrot.slane %v1506_v22, 2 }
  0x38   : > { %3968 = vmatmul.mubr.msk.bf16.gmra.mxu0 %vm5739_vm2, %v580_v41  ;;  %3950 = vmatmul.mubr.msk.bf16.gmra.mxu1 %vm5739_vm2, %v4377_v40  ;;  %v1045_v40 = vshrl.u32 %v4397_v25, 16  ;;  %v1049_v41 = vshll.u32 %v4399_v36, 16  ;;  %v1505_v25 = vrot.slane %v1503_v21, 1  ;;  %v4410_v36 = vld [vmem:[%s4516_s8 + $0x2c] ss:$0 sps:$4 sm:$0x33]  }
  0x39   : > { %3971 = vmatprep.mubr.msk.bf16.mxu0 %vm5744_vm1, %v4446_v1  ;;  %3953 = vmatprep.mubr.msk.bf16.mxu1 %vm5744_vm1, %v4446_v1 }
  0x3a   : > { %v1047_v43 = vor.u32 %v1045_v40, %v1043_v35  ;;  %v1051_v44 = vrot.slane %v1049_v41, 1  ;;  %v1521_v40 = vshrl.u32 %v4410_v36, 16  ;;  %v1524_v41 = vshll.u32 %v4410_v36, 16 }
  0x3c   : > { %v1055_v52 = vor.u32 %v1053_v49, %v1051_v44  ;;  %v1526_v45 = vrot.slane %v1524_v41, 2 }
  0x40   : > { %3972 = vmatmul.mubr.msk.bf16.gmra.mxu0 %vm5739_vm2, %v588_v48  ;;  %3954 = vmatmul.mubr.msk.bf16.gmra.mxu1 %vm5739_vm2, %v4379_v47  ;;  %v4702_v47 = vld [vmem:[%s4516_s8 + $0x24] sm:$0xff]   ;;  %v1052_v48 = vsel %vm5743_vm3, %v1047_v43, %v1051_v44  ;;  %v1523_v44 = vrot.slane %v1521_v40, 1 }
  0x41   : > { %3975 = vmatprep.mubr.msk.bf16.mxu0 %vm5744_vm1, %v4446_v1  ;;  %3981 = vmatprep.mubr.msk.bf16.mxu1 %vm5744_vm1, %v4446_v1  ;;  %v1211_v51 = vrot.slane %v4702_v47, 1  ;;  %v1515_v31 = vshll.u32 %v4702_v47, 16 }
  0x43   : > { %v1517_v35 = vrot.slane %v1515_v31, 2 }
  0x48   : > { %3976 = vmatmul.mubr.msk.bf16.gmra.mxu0 %vm5739_vm2, %v596_v54  ;;  %3982 = vmatmul.mubr.msk.bf16.vlgmr.msra.gmra.mxu1 %vm5739_vm2, %v4382_v55  ;;  %v4403_v54 = vld [vmem:[%s4516_s8 + $0x2c] ss:$0 sps:$4 sm:$0x11]   ;;  %v1212_v55 = vsel %vm5742_vm4, %v1209_v42, %v1211_v51  ;;  %v1366_v42 = vrot.slane %v4409_v38, 1 }
  0x49   : > { %4003 = vmatprep.mubr.msk.bf16.mxu0 %vm5744_vm1, %v4446_v1  ;;  %4024 = vmatpush3.bf16.msra.mxu1 %v1077_v56  ;;  %v1060_v56 = vsel %vm5743_vm3, %v1055_v52, %v1059_v53  ;;  %vm1912_vm3 = vsmask.f32 1280 }
  0x4a   : > { %3985 = vmatprep.mubr.msk.bf16.mxu1 %vm5744_vm1, %v4446_v1  ;;  %4067 = vmatprep.subr.bf16.mxu1 %v4446_v1 }
  0x50   : > { %4004 = vmatmul.mubr.msk.bf16.vlgmr.msra.gmra.mxu0 %vm5739_vm2, %v4384_v58  ;;  %3986 = vmatmul.mubr.msk.bf16.gmra.mxu1 %vm5739_vm2, %v4383_v59  ;;  %v4405_v58 = vld [vmem:[%s4516_s8 + $0x40] sm:$0xff]   ;;  %v1213_v59 = vrot.slane %v4403_v54, 1 }
  0x51   : > { %4046 = vmatpush3.bf16.msra.mxu0 %v1231_v60  ;;  %3989 = vmatprep.mubr.msk.bf16.mxu1 %vm5744_vm1, %v4446_v1  ;;  %v1477_v60 = vshrl.u32 %v4652_v15, 16  ;;  %v1358_v2 = vrot.slane %v4405_v58, 1 }
  0x52   : > { %4007 = vmatprep.mubr.msk.bf16.mxu0 %vm5744_vm1, %v4446_v1  ;;  %4089 = vmatprep.subr.bf16.mxu0 %v4446_v1  ;;  %v1214_v3 = vsel %vm5742_vm4, %v1211_v51, %v1213_v59 }
  0x53   : > { %v1479_v4 = vrot.slane %v1477_v60, 1  ;;  %v1361_v18 = vsel %vm5742_vm4, %v1358_v2, %v1360_v14 }
  0x58   : > { %4008 = vmatmul.mubr.msk.bf16.gmra.mxu0 %vm5739_vm2, %v4386_v61  ;;  %3990 = vmatmul.mubr.msk.bf16.gmra.mxu1 %vm5739_vm2, %v4385_v62  ;;  %v1480_v61 = vshll.u32 %v4652_v15, 16  ;;  %v1485_v62 = vshrl.u32 %v4655_v16, 16 }
  0x59   : > { %4011 = vmatprep.mubr.msk.bf16.mxu0 %vm5744_vm1, %v4446_v1  ;;  %3993 = vmatprep.mubr.msk.bf16.mxu1 %vm5744_vm1, %v4446_v1 }
  0x60   : > { %4012 = vmatmul.mubr.msk.bf16.gmra.mxu0 %vm5739_vm2, %v4388_v63  ;;  %3994 = vmatmul.mubr.msk.bf16.gmra.mxu1 %vm5739_vm2, %v4387_v0  ;;  %v1488_v63 = vshll.u32 %v4655_v16, 16  ;;  %v1357_v0 = vrot.slane %v4404_v57, 1  ;;  %v1496_v16 = vrot.slane %v1494_v12, 1 }
  0x61   : > { %4015 = vmatprep.mubr.msk.bf16.mxu0 %vm5744_vm1, %v4446_v1  ;;  %3997 = vmatprep.mubr.msk.bf16.mxu1 %vm5744_vm1, %v4446_v1 }
  0x62   : > { %v1490_v7 = vrot.slane %v1488_v63, 2  ;;  %v1359_v8 = vsel %vm5742_vm4, %v1357_v0, %v1358_v2 }
  0x68   : > { %4016 = vmatmul.mubr.msk.bf16.gmra.mxu0 %vm5739_vm2, %v4390_v5  ;;  %3998 = vmatmul.mubr.msk.bf16.gmra.mxu1 %vm5739_vm2, %v4389_v6  ;;  %v1482_v5 = vrot.slane %v1480_v61, 2  ;;  %v1487_v6 = vrot.slane %v1485_v62, 1 }
  0x69   : > { %4019 = vmatprep.mubr.msk.bf16.mxu0 %vm5744_vm1, %v4446_v1  ;;  %4025 = vmatprep.mubr.msk.bf16.mxu1 %vm5744_vm1, %v4446_v1 }
  0x6a   : > { %v1483_v10 = vor.u32 %v1482_v5, %v1479_v4  ;;  %v1491_v11 = vor.u32 %v1490_v7, %v1487_v6 }
  0x6c   : > { %v1492_v15 = vsel %vm5741_vm5, %v1483_v10, %v1491_v11 }
  0x70   : > { %4020 = vmatmul.mubr.msk.bf16.gmra.mxu0 %vm5739_vm2, %v4391_v13  ;;  %4026 = vmatmul.mubr.msk.bf16.vlgmr.msra.gmra.mxu1 %vm5739_vm2, %v1028_v17  ;;  %v1497_v13 = vshll.u32 %v4674_v28, 16  ;;  %v4408_v28 = vld [vmem:[%s4516_s8 + $0x58] sm:$0xff]  }
  0x71   : > { %4047 = vmatprep.mubr.msk.bf16.mxu0 %vm5744_vm1, %v4446_v1  ;;  %4068 = vmatpush3.bf16.msra.mxu1 %v1384_v20  ;;  %v1364_v32 = vrot.slane %v4408_v28, 1  ;;  %v3690_v28 = vld [vmem:[%s5735_s3 + $0x4] sm:$0xf] }
  0x72   : > { %4029 = vmatprep.mubr.msk.bf16.mxu1 %vm5744_vm1, %v4446_v1  ;;  %4111 = vmatprep.subr.bf16.mxu1 %v4446_v1  ;;  %v1499_v17 = vrot.slane %v1497_v13, 2  ;;  %v4448_v13 = vmov 0  }
  0x73   : > { %1875 = vst.msk [vmem:[#allocation2 + $0x4] sm:$0xf] %vm5746_vm6, %v4448_v13  ;;  %1874 = vst.msk [vmem:[#allocation2] sm:$0xf] %vm5746_vm6, %v4448_v13 }
  0x74   : > { %v1500_v20 = vor.u32 %v1499_v17, %v1496_v16  ;;  %1876 = vst.msk [vmem:[#allocation2 + $0x8] sm:$0xf] %vm5746_vm6, %v4448_v13  ;;  %1877 = vst.msk [vmem:[#allocation2 + $0xc] sm:$0xf] %vm5746_vm6, %v4448_v13 }
  0x75   : > { %1878 = vst.msk [vmem:[#allocation2 + $0x10] sm:$0xf] %vm5746_vm6, %v4448_v13  ;;  %1879 = vst.msk [vmem:[#allocation2 + $0x14] sm:$0xf] %vm5746_vm6, %v4448_v13 }
  0x76   : > { %v1501_v24 = vsel %vm5741_vm5, %v1491_v11, %v1500_v20  ;;  %1880 = vst.msk [vmem:[#allocation2 + $0x18] sm:$0xf] %vm5746_vm6, %v4448_v13  ;;  %1881 = vst.msk [vmem:[#allocation2 + $0x1c] sm:$0xf] %vm5746_vm6, %v4448_v13 }
  0x77   : > { %1882 = vst.msk [vmem:[#allocation2 + $0x20] sm:$0xf] %vm5746_vm6, %v4448_v13  ;;  %1883 = vst.msk [vmem:[#allocation2 + $0x24] sm:$0xf] %vm5746_vm6, %v4448_v13 }
  0x78   : > { %4048 = vmatmul.mubr.msk.bf16.vlgmr.msra.gmra.mxu0 %vm5739_vm2, %v1206_v27  ;;  %4030 = vmatmul.mubr.msk.bf16.gmra.mxu1 %vm5739_vm2, %v1036_v29  ;;  %v1363_v27 = vsel %vm5742_vm4, %v1360_v14, %v1362_v23  ;;  %v1509_v29 = vor.u32 %v1508_v26, %v1505_v25  ;;  %1884 = vst.msk [vmem:[#allocation2 + $0x28] sm:$0xf] %vm5746_vm6, %v4448_v13  ;;  %1885 = vst.msk [vmem:[#allocation2 + $0x2c] sm:$0xf] %vm5746_vm6, %v4448_v13 }
  0x79   : > { %4090 = vmatpush3.bf16.msra.mxu0 %v1545_v30  ;;  %4033 = vmatprep.mubr.msk.bf16.mxu1 %vm5744_vm1, %v4446_v1  ;;  %v1512_v30 = vshrl.u32 %v4702_v47, 16  ;;  %v1527_v47 = vor.u32 %v1526_v45, %v1523_v44  ;;  %1886 = vst.msk [vmem:[#allocation2 + $0x30] sm:$0xf] %vm5746_vm6, %v4448_v13 }
  0x7a   : > { %4051 = vmatprep.mubr.msk.bf16.mxu0 %vm5744_vm1, %v4446_v1  ;;  %4133 = vmatprep.subr.bf16.mxu0 %v4446_v1  ;;  %v1510_v33 = vsel %vm5741_vm5, %v1500_v20, %v1509_v29 }
  0x7b   : > { %v1514_v34 = vrot.slane %v1512_v30, 1 }
  0x80   : > { %4052 = vmatmul.mubr.msk.bf16.gmra.mxu0 %vm5739_vm2, %v1208_v37  ;;  %4034 = vmatmul.mubr.msk.bf16.gmra.mxu1 %vm5739_vm2, %v1044_v39  ;;  %v1365_v37 = vsel %vm5742_vm4, %v1362_v23, %v1364_v32  ;;  %v1518_v39 = vor.u32 %v1517_v35, %v1514_v34 }
  0x81   : > { %4055 = vmatprep.mubr.msk.bf16.mxu0 %vm5744_vm1, %v4446_v1  ;;  %4037 = vmatprep.mubr.msk.bf16.mxu1 %vm5744_vm1, %v4446_v1 }
  0x82   : > { %v1519_v43 = vsel %vm5741_vm5, %v1509_v29, %v1518_v39  ;;  %v2055_v29 = vld [vmem:[%s5735_s3] sm:$0xf] }
  0x88   : > { %4056 = vmatmul.mubr.msk.bf16.gmra.mxu0 %vm5739_vm2, %v1210_v46  ;;  %4038 = vmatmul.mubr.msk.bf16.gmra.mxu1 %vm5739_vm2, %v1052_v48  ;;  %v1367_v46 = vsel %vm5742_vm4, %v1364_v32, %v1366_v42  ;;  %v1528_v48 = vsel %vm5741_vm5, %v1518_v39, %v1527_v47  ;;  %v2149_v32 = vsel %vm5747_vm7, %v3690_v28, 0 }
  0x89   : > { %4059 = vmatprep.mubr.msk.bf16.mxu0 %vm5744_vm1, %v4446_v1  ;;  %4041 = vmatprep.mubr.msk.bf16.mxu1 %vm5744_vm1, %v4446_v1 }
  0x90   : > { %4060 = vmatmul.mubr.msk.bf16.gmra.mxu0 %vm5739_vm2, %v1212_v55  ;;  %4042 = vmatmul.mubr.msk.bf16.gmra.mxu1 %vm5739_vm2, %v1060_v56 }
  0x91   : > { %4063 = vmatprep.mubr.msk.bf16.mxu0 %vm5744_vm1, %v4446_v1  ;;  %4069 = vmatprep.mubr.msk.bf16.mxu1 %vm5744_vm1, %v4446_v1 }
  0x98   : > { %4064 = vmatmul.mubr.msk.bf16.gmra.mxu0 %vm5739_vm2, %v1214_v3  ;;  %4070 = vmatmul.mubr.msk.bf16.vlgmr.msra.gmra.mxu1 %vm5739_vm2, %v1359_v8 }
  0x99   : > { %4091 = vmatprep.mubr.msk.bf16.mxu0 %vm5744_vm1, %v4446_v1  ;;  %4073 = vmatprep.mubr.msk.bf16.mxu1 %vm5744_vm1, %v4446_v1 }
  0x9a   : > { %4112 = vmatpush3.bf16.msra.mxu1 %v2149_v32 }
  0x9b   : > { %4155 = vmatprep.subr.bf16.mxu1 %v4446_v1 }
  0xa0   : > { %4092 = vmatmul.mubr.msk.bf16.vlgmr.msra.gmra.mxu0 %vm5739_vm2, %v1492_v15  ;;  %4074 = vmatmul.mubr.msk.bf16.gmra.mxu1 %vm5739_vm2, %v1361_v18 }
  0xa1   : > { %4095 = vmatprep.mubr.msk.bf16.mxu0 %vm5744_vm1, %v4446_v1  ;;  %4077 = vmatprep.mubr.msk.bf16.mxu1 %vm5744_vm1, %v4446_v1 }
  0xa8   : > { %4096 = vmatmul.mubr.msk.bf16.gmra.mxu0 %vm5739_vm2, %v1501_v24  ;;  %4078 = vmatmul.mubr.msk.bf16.gmra.mxu1 %vm5739_vm2, %v1363_v27 }
  0xa9   : > { %4099 = vmatprep.mubr.msk.bf16.mxu0 %vm5744_vm1, %v4446_v1  ;;  %4081 = vmatprep.mubr.msk.bf16.mxu1 %vm5744_vm1, %v4446_v1 }
  0xb0   : > { %4100 = vmatmul.mubr.msk.bf16.gmra.mxu0 %vm5739_vm2, %v1510_v33  ;;  %4082 = vmatmul.mubr.msk.bf16.gmra.mxu1 %vm5739_vm2, %v1365_v37  ;;  %v2235_v33 = vsel %vm5747_vm7, %v2055_v29, 0 }
  0xb1   : > { %4103 = vmatprep.mubr.msk.bf16.mxu0 %vm5744_vm1, %v4446_v1  ;;  %4085 = vmatprep.mubr.msk.bf16.mxu1 %vm5744_vm1, %v4446_v1 }
  0xb2   : > { %4134 = vmatpush3.bf16.msra.mxu0 %v2235_v33 }
  0xb3   : > { %4177 = vmatprep.subr.bf16.mxu0 %v4446_v1 }
  0xb8   : > { %4104 = vmatmul.mubr.msk.bf16.gmra.mxu0 %vm5739_vm2, %v1519_v43  ;;  %4086 = vmatmul.mubr.msk.bf16.gmra.mxu1 %vm5739_vm2, %v1367_v46 }
  0xb9   : > { %4107 = vmatprep.mubr.msk.bf16.mxu0 %vm5744_vm1, %v4446_v1  ;;  %4113 = vmatprep.mubr.msk.bf16.mxu1 %vm5744_vm1, %v4446_v1 }
  0xc0   : > { %4108 = vmatmul.mubr.msk.bf16.gmra.mxu0 %vm5739_vm2, %v1528_v48 }
  0xc1   : > { %4135 = vmatprep.mubr.msk.bf16.mxu0 %vm5744_vm1, %v4446_v1  ;;  %vm1913_vm1 = vsmask.f32 5392 }
  0xd0   : > { %v356_v49 = vpop.f32.mrf.mxu0  ;;  %v4782_v50 = vpop.f32.mrf.mxu1 }
  0xd2   : > { %v3917_v51 = vpop.f32.mrf.mxu0  ;;  %v3929_v52 = vpop.f32.mrf.mxu1 }
  0xd4   : > { %v359_v53 = vpop.f32.mrf.mxu0  ;;  %v4784_v54 = vpop.f32.mrf.mxu1 }
  0xd6   : > { %v3918_v55 = vpop.f32.mrf.mxu0  ;;  %v3930_v56 = vpop.f32.mrf.mxu1 }
  0xd8   : > { %v364_v57 = vpop.f32.mrf.mxu0  ;;  %v4786_v58 = vpop.f32.mrf.mxu1 }
  0xda   : > { %v3921_v59 = vpop.f32.mrf.mxu0  ;;  %v3933_v60 = vpop.f32.mrf.mxu1 }
  0xdc   : > { %v367_v61 = vpop.f32.mrf.mxu0  ;;  %v4788_v62 = vpop.f32.mrf.mxu1 }
  0xde   : > { %v3922_v63 = vpop.f32.mrf.mxu0  ;;  %v3934_v0 = vpop.f32.mrf.mxu1 }
  0xe0   : > { %v372_v2 = vpop.f32.mrf.mxu0  ;;  %v472_v3 = vpop.f32.mrf.mxu1 }
  0xe1   : > { %v473_v4 = vadd.f32 %v472_v3, %v356_v49 }
  0xe2   : > { %v3925_v5 = vpop.f32.mrf.mxu0  ;;  %v3939_v6 = vpop.f32.mrf.mxu1 }
  0xe4   : > { %v375_v7 = vpop.f32.mrf.mxu0  ;;  %v475_v8 = vpop.f32.mrf.mxu1 }
  0xe5   : > { %v476_v9 = vadd.f32 %v475_v8, %v359_v53 }
  0xe6   : > { %v3926_v10 = vpop.f32.mrf.mxu0  ;;  %v3940_v11 = vpop.f32.mrf.mxu1 }
  0xe8   : > { %v649_v12 = vpop.f32.mrf.mxu0  ;;  %v480_v14 = vpop.f32.mrf.mxu1 }
  0xe9   : > { %v688_v15 = vadd.f32 %v649_v12, %v473_v4  ;;  %v481_v16 = vadd.f32 %v480_v14, %v364_v57 }
  0xea   : > { %v3961_v17 = vpop.f32.mrf.mxu0  ;;  %v3943_v18 = vpop.f32.mrf.mxu1 }
  0xec   : > { %v652_v19 = vpop.f32.mrf.mxu0  ;;  %v483_v20 = vpop.f32.mrf.mxu1 }
  0xed   : > { %v689_v21 = vadd.f32 %v652_v19, %v476_v9  ;;  %v484_v22 = vadd.f32 %v483_v20, %v367_v61 }
  0xee   : > { %v3962_v23 = vpop.f32.mrf.mxu0  ;;  %v3944_v24 = vpop.f32.mrf.mxu1 }
  0xf0   : > { %v657_v25 = vpop.f32.mrf.mxu0  ;;  %v488_v26 = vpop.f32.mrf.mxu1 }
  0xf1   : > { %v690_v27 = vadd.f32 %v657_v25, %v481_v16  ;;  %v489_v30 = vadd.f32 %v488_v26, %v372_v2 }
  0xf2   : > { %v3965_v31 = vpop.f32.mrf.mxu0  ;;  %v3947_v34 = vpop.f32.mrf.mxu1 }
  0xf4   : > { %v660_v35 = vpop.f32.mrf.mxu0  ;;  %v491_v36 = vpop.f32.mrf.mxu1 }
  0xf5   : > { %v691_v37 = vadd.f32 %v660_v35, %v484_v22  ;;  %v492_v38 = vadd.f32 %v491_v36, %v375_v7 }
  0xf6   : > { %v3966_v39 = vpop.f32.mrf.mxu0  ;;  %v3948_v40 = vpop.f32.mrf.mxu1 }
  0xf8   : > { %v665_v41 = vpop.f32.mrf.mxu0  ;;  %v496_v42 = vpop.f32.mrf.mxu1 }
  0xf9   : > { %v692_v43 = vadd.f32 %v665_v41, %v489_v30  ;;  %v497_v44 = vadd.f32 %v496_v42, %v4782_v50 }
  0xfa   : > { %v3969_v45 = vpop.f32.mrf.mxu0  ;;  %v3951_v46 = vpop.f32.mrf.mxu1 }
  0xfc   : > { %v668_v47 = vpop.f32.mrf.mxu0  ;;  %v499_v48 = vpop.f32.mrf.mxu1 }
  0xfd   : > { %v693_v49 = vadd.f32 %v668_v47, %v492_v38  ;;  %v500_v51 = vadd.f32 %v499_v48, %v4784_v54 }
  0xfe   : > { %v3970_v52 = vpop.f32.mrf.mxu0  ;;  %v3952_v53 = vpop.f32.mrf.mxu1 }
 0x100   : > { %v673_v55 = vpop.f32.mrf.mxu0  ;;  %v504_v56 = vpop.f32.mrf.mxu1 }
 0x101   : > { %v694_v57 = vadd.f32 %v673_v55, %v497_v44  ;;  %v505_v59 = vadd.f32 %v504_v56, %v4786_v58 }
 0x102   : > { %v3973_v60 = vpop.f32.mrf.mxu0  ;;  %v3955_v61 = vpop.f32.mrf.mxu1 }
 0x104   : > { %v676_v63 = vpop.f32.mrf.mxu0  ;;  %v507_v0 = vpop.f32.mrf.mxu1 }
 0x105   : > { %v695_v2 = vadd.f32 %v676_v63, %v500_v51  ;;  %v508_v50 = vadd.f32 %v507_v0, %v4788_v62 }
 0x106   : > { %v3974_v3 = vpop.f32.mrf.mxu0  ;;  %v3956_v4 = vpop.f32.mrf.mxu1 }
 0x108   : > { %v681_v5 = vpop.f32.mrf.mxu0  ;;  %v788_v7 = vpop.f32.mrf.mxu1 }
 0x109   : > { %v696_v6 = vadd.f32 %v681_v5, %v505_v59  ;;  %v827_v54 = vadd.f32 %v788_v7, %v688_v15 }
 0x10a   : > { %v3977_v8 = vpop.f32.mrf.mxu0  ;;  %v3983_v9 = vpop.f32.mrf.mxu1 }
 0x10c   : > { %v684_v10 = vpop.f32.mrf.mxu0  ;;  %v791_v12 = vpop.f32.mrf.mxu1 }
 0x10d   : > { %v697_v11 = vadd.f32 %v684_v10, %v508_v50  ;;  %v828_v13 = vadd.f32 %v791_v12, %v689_v21 }
 0x10e   : > { %v3978_v58 = vpop.f32.mrf.mxu0  ;;  %v3984_v14 = vpop.f32.mrf.mxu1 }
 0x110   : > { %v927_v16 = vpop.f32.mrf.mxu0  ;;  %v796_v17 = vpop.f32.mrf.mxu1 }
 0x111   : > { %v4817_v18 = vadd.f32 %v927_v16, %v827_v54  ;;  %v829_v19 = vadd.f32 %v796_v17, %v690_v27 }
 0x112   : > { %v4005_v62 = vpop.f32.mrf.mxu0  ;;  %v3987_v20 = vpop.f32.mrf.mxu1 }
 0x114   : > { %v930_v22 = vpop.f32.mrf.mxu0  ;;  %v799_v23 = vpop.f32.mrf.mxu1 }
 0x115   : > { %v4819_v24 = vadd.f32 %v930_v22, %v828_v13  ;;  %v830_v15 = vadd.f32 %v799_v23, %v691_v37  ;;  %v1657_v13 = vlaneseq }
 0x116   : > { %v4006_v25 = vpop.f32.mrf.mxu0  ;;  %v3988_v26 = vpop.f32.mrf.mxu1 }
 0x117   : > { %v4847_v17 = vshrl.u32 %v1657_v13, 7 }
 0x118   : > { %v935_v28 = vpop.f32.mrf.mxu0  ;;  %v804_v29 = vpop.f32.mrf.mxu1 }
 0x119   : > { %v4821_v30 = vadd.f32 %v935_v28, %v829_v19  ;;  %v831_v21 = vadd.f32 %v804_v29, %v692_v43  ;;  %v1659_v20 = vadd.s32 8, %v4847_v17  ;;  %v1660_v28 = vadd.s32 16, %v4847_v17 }
 0x11a   : > { %v4009_v31 = vpop.f32.mrf.mxu0  ;;  %v3991_v32 = vpop.f32.mrf.mxu1 }
 0x11c   : > { %v938_v33 = vpop.f32.mrf.mxu0  ;;  %v807_v34 = vpop.f32.mrf.mxu1 }
 0x11d   : > { %v4823_v35 = vadd.f32 %v938_v33, %v830_v15  ;;  %v832_v27 = vadd.f32 %v807_v34, %v693_v49  ;;  %v4855_v15 = vmul.u32.u64.low 3435973837, %v4847_v17  ;;  %v4856_v25 = vmul.u32.u64.high 3435973837, %v4847_v17, %v4855_v15 }
 0x11e   : > { %v4010_v36 = vpop.f32.mrf.mxu0  ;;  %v3992_v38 = vpop.f32.mrf.mxu1 }
 0x11f   : > { %v4872_v38 = vadd.s32 24, %v4847_v17 }
 0x120   : > { %v943_v39 = vpop.f32.mrf.mxu0  ;;  %v812_v40 = vpop.f32.mrf.mxu1 }
 0x121   : > { %v4825_v41 = vadd.f32 %v943_v39, %v831_v21  ;;  %v833_v37 = vadd.f32 %v812_v40, %v694_v57  ;;  %v4861_v21 = vmul.u32.u64.low 3435973837, %v1659_v20  ;;  %v4862_v31 = vmul.u32.u64.high 3435973837, %v1659_v20, %v4861_v21 }
 0x122   : > { %v4013_v42 = vpop.f32.mrf.mxu0  ;;  %v3995_v44 = vpop.f32.mrf.mxu1 }
 0x123   : > { %v1674_v42 = vshrl.u32 %v4856_v25, 3  ;;  %v4878_v44 = vadd.s32 32, %v4847_v17 }
 0x124   : > { %v946_v45 = vpop.f32.mrf.mxu0  ;;  %v815_v46 = vpop.f32.mrf.mxu1 }
 0x125   : > { %v4827_v47 = vadd.f32 %v946_v45, %v832_v27  ;;  %v834_v43 = vadd.f32 %v815_v46, %v695_v2  ;;  %v4868_v27 = vmul.u32.u64.low 3435973837, %v1660_v28  ;;  %v4869_v36 = vmul.u32.u64.high 3435973837, %v1660_v28, %v4868_v27 }
 0x126   : > { %v4014_v48 = vpop.f32.mrf.mxu0  ;;  %v3996_v51 = vpop.f32.mrf.mxu1 }
 0x127   : > { %v1685_v51 = vshrl.u32 %v4862_v31, 3 }
 0x128   : > { %v951_v52 = vpop.f32.mrf.mxu0  ;;  %v820_v53 = vpop.f32.mrf.mxu1 }
 0x129   : > { %v4829_v55 = vadd.f32 %v951_v52, %v833_v37  ;;  %v835_v49 = vadd.f32 %v820_v53, %v696_v6  ;;  %v4888_v52 = vadd.s32 40, %v4847_v17 }
 0x12a   : > { %v4017_v56 = vpop.f32.mrf.mxu0  ;;  %v3999_v59 = vpop.f32.mrf.mxu1 }
 0x12b   : > { %v1675_v56 = vmul.u32 10, %v1674_v42 }
 0x12c   : > { %v954_v60 = vpop.f32.mrf.mxu0  ;;  %v823_v61 = vpop.f32.mrf.mxu1 }
 0x12d   : > { %v4831_v63 = vadd.f32 %v954_v60, %v834_v43  ;;  %v836_v57 = vadd.f32 %v823_v61, %v697_v11  ;;  %v4883_v46 = vmul.u32.u64.low 3435973837, %v4872_v38  ;;  %v4884_v43 = vmul.u32.u64.high 3435973837, %v4872_v38, %v4883_v46 }
 0x12e   : > { %v4018_v0 = vpop.f32.mrf.mxu0  ;;  %v4000_v50 = vpop.f32.mrf.mxu1  ;;  %v4893_v59 = vmul.u32.u64.low 3435973837, %v4878_v44  ;;  %v4894_v60 = vmul.u32.u64.high 3435973837, %v4878_v44, %v4893_v59  ;;  %v4897_v61 = vadd.s32 48, %v4847_v17 }
 0x12f   : > { %v1696_v0 = vshrl.u32 %v4869_v36, 3  ;;  %v4903_v50 = vadd.s32 56, %v4847_v17  ;;  %v1707_v25 = vshrl.u32 %v4884_v43, 3 }
 0x130   : > { %v959_v3 = vpop.f32.mrf.mxu0  ;;  %v4835_v2 = vpop.f32.mrf.mxu1  ;;  %v1718_v42 = vshrl.u32 %v4894_v60, 3 }
 0x131   : > { %v4833_v4 = vadd.f32 %v959_v3, %v835_v49  ;;  %v1697_v15 = vmul.u32 10, %v1696_v0 }
 0x132   : > { %v4021_v5 = vpop.f32.mrf.mxu0  ;;  %v4027_v7 = vpop.f32.mrf.mxu1 }
 0x133   : > { %v1686_v5 = vmul.u32 10, %v1685_v51  ;;  %v4939_v43 = vsub.s32 %v1660_v28, %v1697_v15 }
 0x134   : > { %v962_v54 = vpop.f32.mrf.mxu0  ;;  %v4839_v6 = vpop.f32.mrf.mxu1 }
 0x135   : > { %v4837_v8 = vadd.f32 %v962_v54, %v836_v57  ;;  %v4906_v7 = vmul.u32.u64.low 3435973837, %v4888_v52  ;;  %v4907_v54 = vmul.u32.u64.high 3435973837, %v4888_v52, %v4906_v7  ;;  %vm1780_vm14 = vcmp.ne.s32.totalorder %v4939_v43, 0 }
 0x136   : > { %v4022_v9 = vpop.f32.mrf.mxu0  ;;  %v4028_v10 = vpop.f32.mrf.mxu1  ;;  %vm1790_vm15 = vcmp.lt.s32.totalorder %v4939_v43, 0 }
 0x137   : > { %v4910_v9 = vadd.s32 64, %v4847_v17 }
 0x138   : > { %v4841_v12 = vpop.f32.mrf.mxu0  ;;  %v4843_v11 = vpop.f32.mrf.mxu1 }
 0x139   : > { %v4929_v27 = vmul.u32.u64.low 3435973837, %v4910_v9  ;;  %v4930_v36 = vmul.u32.u64.high 3435973837, %v4910_v9, %v4929_v27 }
 0x13a   : > { %v4049_v58 = vpop.f32.mrf.mxu0  ;;  %v4031_v14 = vpop.f32.mrf.mxu1 }
 0x13b   : > { %v4915_v58 = vsub.s32 %v4847_v17, %v1675_v56 }
 0x13c   : > { %v4845_v16 = vpop.f32.mrf.mxu0  ;;  %v4849_v19 = vpop.f32.mrf.mxu1 }
 0x13d   : > { %vm1778_vm8 = vcmp.ne.s32.totalorder %v4915_v58, 0  ;;  %vm1788_vm9 = vcmp.lt.s32.totalorder %v4915_v58, 0  ;;  %v1808_v59 = vadd.s32 10, %v4915_v58 }
 0x13e   : > { %v4050_v62 = vpop.f32.mrf.mxu0  ;;  %v4032_v22 = vpop.f32.mrf.mxu1  ;;  %vm4948_vm12 = vmand %vm1788_vm9, %vm1778_vm8 }
 0x13f   : > { %v4918_v14 = vmul.u32.u64.low 3435973837, %v4897_v61  ;;  %v4919_v62 = vmul.u32.u64.high 3435973837, %v4897_v61, %v4918_v14  ;;  %vm4986_vm8 = vmand %vm1790_vm15, %vm1780_vm14 }
 0x140   : > { %v4852_v23 = vpop.f32.mrf.mxu0  ;;  %v4858_v26 = vpop.f32.mrf.mxu1 }
 0x142   : > { %v4053_v29 = vpop.f32.mrf.mxu0  ;;  %v4035_v32 = vpop.f32.mrf.mxu1 }
 0x143   : > { %v4925_v29 = vmul.u32.u64.low 3435973837, %v4903_v50  ;;  %v4926_v21 = vmul.u32.u64.high 3435973837, %v4903_v50, %v4925_v29  ;;  %v1687_v32 = vsub.s32 %v1659_v20, %v1686_v5  ;;  %v1729_v20 = vshrl.u32 %v4907_v54, 3 }
 0x144   : > { %v4864_v33 = vpop.f32.mrf.mxu0  ;;  %v4866_v34 = vpop.f32.mrf.mxu1  ;;  %v1740_v5 = vshrl.u32 %v4919_v62, 3 }
 0x145   : > { %vm1779_vm10 = vcmp.ne.s32.totalorder %v1687_v32, 0  ;;  %vm1789_vm11 = vcmp.lt.s32.totalorder %v1687_v32, 0  ;;  %v1809_v28 = vadd.s32 10, %v1687_v32  ;;  %v1751_v54 = vshrl.u32 %v4926_v21, 3 }
 0x146   : > { %v4054_v39 = vpop.f32.mrf.mxu0  ;;  %v4036_v40 = vpop.f32.mrf.mxu1  ;;  %vm4953_vm13 = vmand %vm1789_vm11, %vm1779_vm10  ;;  %v1730_v15 = vmul.u32 10, %v1729_v20 }
 0x147   : > { %v1819_v21 = vsel %vm4953_vm13, %v1809_v28, %v1687_v32 }
 0x148   : > { %v4874_v37 = vpop.f32.mrf.mxu0  ;;  %v4880_v45 = vpop.f32.mrf.mxu1 }
 0x14a   : > { %v4057_v48 = vpop.f32.mrf.mxu0  ;;  %v4039_v53 = vpop.f32.mrf.mxu1 }
 0x14b   : > { %v1708_v48 = vmul.u32 10, %v1707_v25  ;;  %v4943_v53 = vadd.s32 72, %v4847_v17  ;;  %v1762_v25 = vshrl.u32 %v4930_v36, 3 }
 0x14c   : > { %v4890_v49 = vpop.f32.mrf.mxu0  ;;  %v4899_v57 = vpop.f32.mrf.mxu1 }
 0x14d   : > { %v4960_v17 = vsub.s32 %v4872_v38, %v1708_v48  ;;  %v4965_v62 = vmul.u32.u64.low 3435973837, %v4943_v53  ;;  %v4966_v29 = vmul.u32.u64.high 3435973837, %v4943_v53, %v4965_v62  ;;  %v1741_v48 = vmul.u32 10, %v1740_v5  ;;  %v5005_v5 = vld [vmem:[%s5734_s2] ss:$0 sm:$0xff] }
 0x14e   : > { %v4058_v3 = vpop.f32.mrf.mxu0  ;;  %v4040_v10 = vpop.f32.mrf.mxu1  ;;  %v1763_v32 = vmul.u32 10, %v1762_v25  ;;  %v1154_v62 = vadd.f32 %v4843_v11, %v4821_v30 }
 0x14f   : > { %v1719_v3 = vmul.u32 10, %v1718_v42  ;;  %v1810_v42 = vadd.s32 10, %v4939_v43  ;;  %vm1781_vm9 = vcmp.ne.s32.totalorder %v4960_v17, 0  ;;  %vm1791_vm10 = vcmp.lt.s32.totalorder %v4960_v17, 0 }
 0x150   : > { %v4912_v13 = vpop.f32.mrf.mxu0  ;;  %v4921_v22 = vpop.f32.mrf.mxu1  ;;  %v1811_v28 = vadd.s32 10, %v4960_v17  ;;  %vm5018_vm13 = vmand %vm1791_vm10, %vm1781_vm9  ;;  %vm2026_vm9 = vsmask.f32 7942 }
 0x151   : > { %v4979_v36 = vsub.s32 %v4878_v44, %v1719_v3  ;;  %v4993_v44 = vsub.s32 %v4888_v52, %v1730_v15  ;;  %v2028_v52 = vld [vmem:[#allocation2 + $0x4] sm:$0xe] }
 0x152   : > { %v4061_v31 = vpop.f32.mrf.mxu0  ;;  %v4043_v39 = vpop.f32.mrf.mxu1 }
 0x153   : > { %v1152_v31 = vadd.f32 %v4835_v2, %v4817_v18  ;;  %v1818_v39 = vsel %vm4948_vm12, %v1808_v59, %v4915_v58  ;;  %v1752_v2 = vmul.u32 10, %v1751_v54  ;;  %vm5007_vm12 = vcmp.lt.s32.totalorder %v1819_v21, 8 }
 0x154   : > { %v4932_v40 = vpop.f32.mrf.mxu0  ;;  %v4935_v46 = vpop.f32.mrf.mxu1  ;;  %vm4997_vm11 = vcmp.lt.s32.totalorder %v1818_v39, 8  ;;  %vm1782_vm14 = vcmp.ne.s32.totalorder %v4979_v36, 0  ;;  %vm1792_vm15 = vcmp.lt.s32.totalorder %v4979_v36, 0  ;;  %vm1783_vm10 = vcmp.ne.s32.totalorder %v4993_v44, 0 }
 0x155   : > { %v5032_v15 = vsub.s32 %v4903_v50, %v1752_v2  ;;  %vm1793_vm2 = vcmp.lt.s32.totalorder %v4993_v44, 0  ;;  %v1821_v39 = vsel %vm5018_vm13, %v1811_v28, %v4960_v17  ;;  %vm5054_vm5 = vmand %vm1792_vm15, %vm1782_vm14  ;;  %v5059_v30 = vadd.s32 10, %v4993_v44 }
 0x156   : > { %v4062_v51 = vpop.f32.mrf.mxu0  ;;  %v4044_v56 = vpop.f32.mrf.mxu1  ;;  %v1308_v17 = vadd.f32 %v4852_v23, %v1154_v62  ;;  %vm5071_vm14 = vmand %vm1793_vm2, %vm1783_vm10  ;;  %v1155_v2 = vadd.f32 %v4849_v19, %v4823_v35  ;;  %vm5092_vm10 = vcmp.lt.s32.totalorder %v1821_v39, 8 }
 0x157   : > { %v1306_v51 = vadd.f32 %v4841_v12, %v1152_v31  ;;  %v1153_v12 = vadd.f32 %v4839_v6, %v4819_v24  ;;  %v1820_v24 = vsel %vm4986_vm8, %v1810_v42, %v4939_v43  ;;  %v5029_v43 = vadd.s32 10, %v4979_v36 }
 0x158   : > { %v4946_v60 = vpop.f32.mrf.mxu0  ;;  %v1420_v7 = vpop.f32.mrf.mxu1  ;;  %vm5046_vm0 = vcmp.lt.s32.totalorder %v1820_v24, 8  ;;  %vm1785_vm15 = vcmp.ne.s32.totalorder %v5032_v15, 0  ;;  %vm1795_vm6 = vcmp.lt.s32.totalorder %v5032_v15, 0  ;;  %v1823_v19 = vsel %vm5071_vm14, %v5059_v30, %v4993_v44 }
 0x159   : > { %v1459_v56 = vadd.f32 %v1420_v7, %v1306_v51  ;;  %v5025_v7 = vsub.s32 %v4897_v61, %v1741_v48  ;;  %v1307_v10 = vadd.f32 %v4845_v16, %v1153_v12  ;;  %v5037_v61 = vsub.s32 %v4910_v9, %v1763_v32 }
 0x15a   : > { %v4065_v14 = vpop.f32.mrf.mxu0  ;;  %v4071_v27 = vpop.f32.mrf.mxu1  ;;  %v1773_v16 = vshrl.u32 %v4966_v29, 3  ;;  %v1822_v35 = vsel %vm5054_vm5, %v5029_v43, %v4979_v36  ;;  %v5105_v0 = vadd.s32 10, %v5032_v15  ;;  %v1309_v6 = vadd.f32 %v4864_v33, %v1155_v2 }
 0x15b   : > { %vm1784_vm4 = vcmp.ne.s32.totalorder %v5025_v7, 0  ;;  %vm1794_vm13 = vcmp.lt.s32.totalorder %v5025_v7, 0  ;;  %v5064_v11 = vadd.s32 10, %v5025_v7  ;;  %vm1786_vm7 = vcmp.ne.s32.totalorder %v5037_v61, 0 }
 0x15c   : > { %v4973_v38 = vpop.f32.mrf.mxu0  ;;  %v1423_v20 = vpop.f32.mrf.mxu1  ;;  %vm1796_vm8 = vcmp.lt.s32.totalorder %v5037_v61, 0  ;;  %v1774_v23 = vmul.u32 10, %v1773_v16  ;;  %vm5088_vm2 = vmand %vm1794_vm13, %vm1784_vm4  ;;  %v5117_v36 = vadd.s32 10, %v5037_v61 }
 0x15d   : > { %v1460_v31 = vadd.f32 %v1423_v20, %v1307_v10  ;;  %vm5112_vm4 = vmand %vm1795_vm6, %vm1785_vm15  ;;  %v1824_v33 = vsel %vm5088_vm2, %v5064_v11, %v5025_v7  ;;  %vm5139_vm6 = vcmp.lt.s32.totalorder %v1822_v35, 8  ;;  %vm5786_vm15 = vcmask 60416  }
 0x15e   : > { %v4066_v58 = vpop.f32.mrf.mxu0  ;;  %v4072_v59 = vpop.f32.mrf.mxu1  ;;  %vm5127_vm5 = vmand %vm1796_vm8, %vm1786_vm7  ;;  %vm5776_vm7 = vcmask 60417   ;;  %vm5783_vm8 = vcmask 1043456   ;;  %vm5197_vm14 = vcmp.lt.s32.totalorder %v1824_v33, 8 }
 0x160   : > { %v1581_v3 = vpop.f32.mrf.mxu0  ;;  %v1428_v54 = vpop.f32.mrf.mxu1 }
 0x161   : > { %v1620_v14 = vadd.f32 %v1581_v3, %v1459_v56  ;;  %v1461_v58 = vadd.f32 %v1428_v54, %v1308_v17 }
 0x162   : > { %v4093_v25 = vpop.f32.mrf.mxu0  ;;  %v4075_v50 = vpop.f32.mrf.mxu1 }
 0x163   : > { %v1637_v27 = vadd.f32 %v5005_v5, %v1620_v14 }
 0x164   : > { %v1584_v21 = vpop.f32.mrf.mxu0  ;;  %v1431_v48 = vpop.f32.mrf.mxu1 }
 0x165   : > { %v1647_v29 = vmax.f32 %v1637_v27, 0.0  ;;  %v1621_v51 = vadd.f32 %v1584_v21, %v1460_v31  ;;  %v5132_v31 = vsub.s32 %v4943_v53, %v1774_v23  ;;  %v1156_v27 = vadd.f32 %v4858_v26, %v4825_v41 }
 0x166   : > { %v4094_v18 = vpop.f32.mrf.mxu0  ;;  %v4076_v56 = vpop.f32.mrf.mxu1  ;;  %v1462_v50 = vadd.f32 %v1431_v48, %v1309_v6  ;;  %v1825_v41 = vsel %vm5112_vm4, %v5105_v0, %v5032_v15  ;;  %v1157_v23 = vadd.f32 %v4866_v34, %v4827_v47 }
 0x167   : > { %v1858_v32 = vsel %vm4997_vm11, %v1647_v29, 0.0  ;;  %v1638_v12 = vadd.f32 %v5005_v5, %v1621_v51  ;;  %v1310_v26 = vadd.f32 %v4874_v37, %v1156_v27  ;;  %vm5150_vm11 = vmand %vm5776_vm7, %vm2026_vm9  ;;  %v1826_v18 = vsel %vm5127_vm5, %v5117_v36, %v5037_v61 }
 0x168   : > { %v3789_v28 = vpack.c.bf16 %v1858_v32, %v1858_v32  ;;  %v1589_v3 = vpop.f32.mrf.mxu0  ;;  %v1436_v54 = vpop.f32.mrf.mxu1  ;;  %v5167_v35 = vadd.s32 10, %v5132_v31  ;;  %v1311_v47 = vadd.f32 %v4890_v49, %v1157_v23  ;;  %vm2131_vm9 = vcmask 64512  }
 0x169   : > { %v1648_v10 = vmax.f32 %v1638_v12, 0.0  ;;  %v1622_v14 = vadd.f32 %v1589_v3, %v1461_v58  ;;  %v3714_v12 = vld [vmem:[%s5735_s3 + $0xc] sm:$0xf]  ;;  %v1463_v56 = vadd.f32 %v1436_v54, %v1310_v26  ;;  %vm1797_vm13 = vcmp.lt.s32.totalorder %v5132_v31, 0 }
 0x16a   : > { %v1916_v44 = vshrl.u32 %v3789_v28, 16  ;;  %v1919_v43 = vshll.u32 %v3789_v28, 16  ;;  %v4097_v16 = vpop.f32.mrf.mxu0  ;;  %v4079_v21 = vpop.f32.mrf.mxu1  ;;  %v5183_v27 = vsel %vm5783_vm8, %v3714_v12, 0  ;;  %vm5215_vm2 = vcmp.lt.s32.totalorder %v1825_v41, 8 }
 0x16b   : > { %v1859_v39 = vsel %vm5007_vm12, %v1648_v10, 0.0  ;;  %v1639_v7 = vadd.f32 %v5005_v5, %v1622_v14  ;;  %vm5172_vm12 = vcmp.lt.s32.totalorder %v1823_v19, 8  ;;  %v1158_v19 = vadd.f32 %v4880_v45, %v4829_v55 }
 0x16c   : > { %v1918_v9 = vrot.slane %v1916_v44, 6  ;;  %v1921_v30 = vrot.slane %v1919_v43, 7  ;;  %v3790_v11 = vpack.c.bf16 %v1859_v39, %v1859_v39  ;;  %v1592_v17 = vpop.f32.mrf.mxu0  ;;  %v1439_v51 = vpop.f32.mrf.mxu1  ;;  %v1159_v55 = vadd.f32 %v4899_v57, %v4831_v63 }
 0x16d   : > { %v1649_v48 = vmax.f32 %v1639_v7, 0.0  ;;  %v1623_v20 = vadd.f32 %v1592_v17, %v1462_v50  ;;  %v1464_v7 = vadd.f32 %v1439_v51, %v1311_v47  ;;  %v1312_v45 = vadd.f32 %v4912_v13, %v1158_v19 }
 0x16e   : > { %v1922_v2 = vor.u32 %v1921_v30, %v1918_v9  ;;  %v1925_v37 = vshrl.u32 %v3790_v11, 16  ;;  %v1928_v58 = vshll.u32 %v3790_v11, 16  ;;  %v4098_v32 = vpop.f32.mrf.mxu0  ;;  %v4080_v3 = vpop.f32.mrf.mxu1  ;;  %v1160_v63 = vadd.f32 %v4921_v22, %v4833_v4 }
 0x16f   : > { %v1860_v59 = vsel %vm5046_vm0, %v1649_v48, 0.0  ;;  %v1640_v28 = vadd.f32 %v5005_v5, %v1623_v20  ;;  %vm5178_vm0 = vmor %vm1912_vm3, %vm1913_vm1  ;;  %vm1787_vm1 = vcmp.ne.s32.totalorder %v5132_v31, 0  ;;  %v1313_v3 = vadd.f32 %v4932_v40, %v1159_v55 }
 0x170   : > { %v2029_v34 = vsel %vm5150_vm11, %v1922_v2, %v2028_v52  ;;  %v1927_v6 = vrot.slane %v1925_v37, 6  ;;  %v1930_v10 = vrot.slane %v1928_v58, 7  ;;  %v1597_v14 = vpop.f32.mrf.mxu0  ;;  %v3791_v54 = vpack.c.bf16 %v1860_v59, %v1860_v59  ;;  %v1444_v49 = vpop.f32.mrf.mxu1  ;;  %vm5250_vm5 = vmand %vm1797_vm13, %vm1787_vm1 }
 0x171   : > { %2030 = vst [vmem:[#allocation2 + $0x4] sm:$0xe] %v2029_v34  ;;  %v1650_v43 = vmax.f32 %v1640_v28, 0.0  ;;  %v1624_v16 = vadd.f32 %v1597_v14, %v1463_v56  ;;  %v1923_v50 = vrot.slane %v1922_v2, 4  ;;  %v1465_v58 = vadd.f32 %v1444_v49, %v1312_v45  ;;  %v2045_v14 = vld [vmem:[#allocation2] sm:$0xf] }
 0x172   : > { %v1931_v39 = vor.u32 %v1930_v10, %v1927_v6  ;;  %v4101_v21 = vpop.f32.mrf.mxu0  ;;  %v1935_v9 = vshrl.u32 %v3791_v54, 16  ;;  %v1938_v30 = vshll.u32 %v3791_v54, 16  ;;  %v4083_v26 = vpop.f32.mrf.mxu1  ;;  %v1161_v29 = vadd.f32 %v4935_v46, %v4837_v8 }
 0x173   : > { %v1861_v11 = vsel %vm5092_vm10, %v1650_v43, 0.0  ;;  %v1641_v17 = vadd.f32 %v5005_v5, %v1624_v16  ;;  %vm5789_vm10 = vmmov %vm5786_vm15  ;;  %vm5238_vm4 = vcmp.lt.s32.totalorder %v1826_v18, 8  ;;  %vm5795_vm7 = vmmov 0  }
 0x174   : > { %v1932_v53 = vsel %vm5178_vm0, %v1923_v50, %v1931_v39  ;;  %v3792_v52 = vpack.c.bf16 %v1861_v11, %v1861_v11  ;;  %v1600_v48 = vpop.f32.mrf.mxu0  ;;  %v1937_v24 = vrot.slane %v1935_v9, 6  ;;  %v1940_v20 = vrot.slane %v1938_v30, 7  ;;  %v1447_v2 = vpop.f32.mrf.mxu1 }
 0x175   : > { %2031 = vst.msk [vmem:[#allocation2 + $0x8] sm:$0xf] %vm5786_vm15, %v1932_v53  ;;  %v1651_v23 = vmax.f32 %v1641_v17, 0.0  ;;  %v1625_v37 = vadd.f32 %v1600_v48, %v1464_v7  ;;  %v1933_v12 = vrot.slane %v1931_v39, 4  ;;  %v1466_v0 = vadd.f32 %v1447_v2, %v1313_v3 }
 0x176   : > { %v1945_v57 = vshrl.u32 %v3792_v52, 16  ;;  %v1948_v13 = vshll.u32 %v3792_v52, 16  ;;  %v4102_v32 = vpop.f32.mrf.mxu0  ;;  %v1941_v56 = vor.u32 %v1940_v20, %v1937_v24  ;;  %v4084_v28 = vpop.f32.mrf.mxu1  ;;  %v1314_v7 = vadd.f32 %v4946_v60, %v1160_v63 }
 0x177   : > { %v1862_v33 = vsel %vm5139_vm6, %v1651_v23, 0.0  ;;  %v1642_v59 = vadd.f32 %v5005_v5, %v1625_v37  ;;  %v1315_v17 = vadd.f32 %v4973_v38, %v1161_v29  ;;  %vm5792_vm6 = vmmov %vm5789_vm10  ;;  %vm5800_vm1 = vcmask 1043456  }
 0x178   : > { %v1947_v47 = vrot.slane %v1945_v57, 6  ;;  %v1950_v34 = vrot.slane %v1948_v13, 7  ;;  %v3793_v6 = vpack.c.bf16 %v1862_v33, %v1862_v33  ;;  %v1605_v10 = vpop.f32.mrf.mxu0  ;;  %v5208_v4 = vld [vmem:[#allocation2 + $0x4] sm:$0xf]  ;;  %v1942_v40 = vsel %vm5178_vm0, %v1933_v12, %v1941_v56  ;;  %v1452_v43 = vpop.f32.mrf.mxu1  ;;  %vm5796_vm11 = vmmov %vm5792_vm6 }
 0x179   : > { %v1652_v54 = vmax.f32 %v1642_v59, 0.0  ;;  %v1626_v49 = vadd.f32 %v1605_v10, %v1465_v58  ;;  %v1943_v16 = vrot.slane %v1941_v56, 4  ;;  %2032 = vst.msk [vmem:[#allocation2 + $0xc] sm:$0xf] %vm5789_vm10, %v1942_v40  ;;  %v5228_v46 = vcombine.low %v2045_v14, %v5208_v4  ;;  %vm5801_vm13 = vmmov %vm5792_vm6 }
 0x17a   : > { %v1951_v25 = vor.u32 %v1950_v34, %v1947_v47  ;;  %v1955_v19 = vshrl.u32 %v3793_v6, 16  ;;  %v1958_v50 = vshll.u32 %v3793_v6, 16  ;;  %v4105_v15 = vpop.f32.mrf.mxu0  ;;  %v4087_v8 = vpop.f32.mrf.mxu1  ;;  %v1467_v38 = vadd.f32 %v1452_v43, %v1314_v7  ;;  %vm5803_vm15 = vmmov %vm5792_vm6 }
 0x17b   : > { %v1863_v41 = vsel %vm5172_vm12, %v1652_v54, 0.0  ;;  %v1643_v39 = vadd.f32 %v5005_v5, %v1626_v49  ;;  %4136 = vmatmul.mubr.msk.bf16.vlgmr.msra.gmra.mxu0 %vm2131_vm9, %v5228_v46  ;;  %v2090_v53 = vshll.u32 %v5228_v46, 16  ;;  %v2088_v54 = vshrl.u32 %v5228_v46, 16  ;;  %vm5797_vm12 = vmmov %vm5792_vm6 }
 0x17c   : > { %v1952_v21 = vsel %vm5178_vm0, %v1943_v16, %v1951_v25  ;;  %v1957_v9 = vrot.slane %v1955_v19, 6  ;;  %v1960_v30 = vrot.slane %v1958_v50, 7  ;;  %v1608_v11 = vpop.f32.mrf.mxu0  ;;  %v3794_v60 = vpack.c.bf16 %v1863_v41, %v1863_v41  ;;  %v1455_v55 = vpop.f32.mrf.mxu1  ;;  %4139 = vmatprep.mubr.msk.bf16.mxu0 %vm5795_vm7, %v4446_v1  ;;  %4178 = vmatpush3.bf16.msra.mxu0 %v5183_v27 }
 0x17d   : > { %2033 = vst.msk [vmem:[#allocation2 + $0x10] sm:$0xf] %vm5792_vm6, %v1952_v21  ;;  %v1653_v26 = vmax.f32 %v1643_v39, 0.0  ;;  %v1627_v45 = vadd.f32 %v1608_v11, %v1466_v0  ;;  %v1953_v36 = vrot.slane %v1951_v25, 4  ;;  %4221 = vmatprep.subr.bf16.mxu0 %v4446_v1  ;;  %v1468_v63 = vadd.f32 %v1455_v55, %v1315_v17 }
 0x17e   : > { %v1961_v62 = vor.u32 %v1960_v30, %v1957_v9  ;;  %v4106_v18 = vpop.f32.mrf.mxu0  ;;  %v1965_v52 = vshrl.u32 %v3794_v60, 16  ;;  %v1968_v48 = vshll.u32 %v3794_v60, 16  ;;  %v4088_v23 = vpop.f32.mrf.mxu1  ;;  %v1827_v27 = vsel %vm5250_vm5, %v5167_v35, %v5132_v31  ;;  %v3707_v35 = vld [vmem:[%s5735_s3 + $0x8] sm:$0xf] }
 0x17f   : > { %v1864_v24 = vsel %vm5197_vm14, %v1653_v26, 0.0  ;;  %v1644_v20 = vadd.f32 %v5005_v5, %v1627_v45  ;;  %v2092_v3 = vrot.slane %v2090_v53, 1  ;;  %vm5289_vm8 = vcmp.lt.s32.totalorder %v1827_v27, 8 }
 0x180   : > { %v1962_v2 = vsel %vm5178_vm0, %v1953_v36, %v1961_v62  ;;  %v3795_v37 = vpack.c.bf16 %v1864_v24, %v1864_v24  ;;  %v1613_v57 = vpop.f32.mrf.mxu0  ;;  %v1967_v51 = vrot.slane %v1965_v52, 6  ;;  %v1970_v13 = vrot.slane %v1968_v48, 7  ;;  %v5269_v12 = vld [vmem:[#allocation2 + $0x8] sm:$0xff]  }
 0x181   : > { %2034 = vst.msk [vmem:[#allocation2 + $0x14] sm:$0xf] %vm5796_vm11, %v1962_v2  ;;  %v1654_v58 = vmax.f32 %v1644_v20, 0.0  ;;  %v1628_v32 = vadd.f32 %v1613_v57, %v1467_v38  ;;  %v1963_v56 = vrot.slane %v1961_v62, 4  ;;  %v2095_v31 = vshll.u32 %v5269_v12, 16  ;;  %vm5809_vm11 = vmmov %vm5800_vm1 }
 0x182   : > { %v1975_v33 = vshrl.u32 %v3795_v37, 16  ;;  %v1978_v59 = vshll.u32 %v3795_v37, 16  ;;  %v4109_v28 = vpop.f32.mrf.mxu0  ;;  %v1971_v47 = vor.u32 %v1970_v13, %v1967_v51  ;;  %v2093_v46 = vor.u32 %v2092_v3, %v2088_v54 }
 0x183   : > { %v1865_v34 = vsel %vm5215_vm2, %v1654_v58, 0.0  ;;  %v1645_v6 = vadd.f32 %v5005_v5, %v1628_v32  ;;  %4140 = vmatmul.mubr.msk.bf16.gmra.mxu0 %vm2131_vm9, %v5269_v12  ;;  %v2097_v0 = vrot.slane %v2095_v31, 1  ;;  %v2343_v30 = vsel %vm5800_vm1, %v3707_v35, 0 }
 0x184   : > { %v1977_v10 = vrot.slane %v1975_v33, 6  ;;  %v1980_v14 = vrot.slane %v1978_v59, 7  ;;  %v3796_v29 = vpack.c.bf16 %v1865_v34, %v1865_v34  ;;  %v1616_v40 = vpop.f32.mrf.mxu0  ;;  %v1972_v43 = vsel %vm5178_vm0, %v1963_v56, %v1971_v47  ;;  %4143 = vmatprep.mubr.msk.bf16.mxu0 %vm5795_vm7, %v4446_v1  ;;  %v2042_v33 = vld [vmem:[#allocation2 + $0x2c] sm:$0x3] }
 0x185   : > { %v1973_v49 = vrot.slane %v1971_v47, 4  ;;  %v1655_v22 = vmax.f32 %v1645_v6, 0.0  ;;  %v1629_v16 = vadd.f32 %v1616_v40, %v1468_v63  ;;  %2035 = vst.msk [vmem:[#allocation2 + $0x18] sm:$0xf] %vm5797_vm12, %v1972_v43  ;;  %vm5802_vm14 = vsmask.f32 7424 }
 0x186   : > { %v1981_v25 = vor.u32 %v1980_v14, %v1977_v10  ;;  %v1985_v19 = vshrl.u32 %v3796_v29, 16  ;;  %v1988_v50 = vshll.u32 %v3796_v29, 16  ;;  %v4110_v15 = vpop.f32.mrf.mxu0  ;;  %v2099_v62 = vshrl.u32 %v5269_v12, 16  ;;  %vm5804_vm2 = vmmov %vm5802_vm14  ;;  %v2428_v14 = vld [vmem:[#allocation2 + $0x4] sm:$0xe]  ;;  %v5344_v40 = vld [vmem:[#allocation2 + $0xc] sm:$0xff]  }
 0x187   : > { %v1866_v41 = vsel %vm5238_vm4, %v1655_v22, 0.0  ;;  %v1646_v39 = vadd.f32 %v5005_v5, %v1629_v16  ;;  %v2098_v5 = vsel %vm5802_vm14, %v2093_v46, %v2097_v0  ;;  %vm2040_vm10 = vcmask 58368   ;;  %vm5805_vm4 = vmmov %vm5792_vm6  ;;  %v5342_v29 = vld [vmem:[#allocation2 + $0x8] sm:$0xf] }
 0x188   : > { %v1982_v7 = vsel %vm5178_vm0, %v1973_v49, %v1981_v25  ;;  %v1987_v21 = vrot.slane %v1985_v19, 6  ;;  %v1990_v9 = vrot.slane %v1988_v50, 7  ;;  %v5296_v11 = vld [vmem:[#allocation2 + $0x10] sm:$0xff]   ;;  %v3797_v44 = vpack.c.bf16 %v1866_v41, %v1866_v41  ;;  %4114 = vmatmul.mubr.msk.bf16.vlgmr.msra.gmra.mxu1 %vm2131_vm9, %v2098_v5  ;;  %vm2041_vm6 = vmand %vm2040_vm10, %vm1912_vm3 }
 0x189   : > { %2036 = vst.msk [vmem:[#allocation2 + $0x1c] sm:$0xf] %vm5801_vm13, %v1982_v7  ;;  %v1656_v17 = vmax.f32 %v1646_v39, 0.0  ;;  %v1983_v60 = vrot.slane %v1981_v25, 4  ;;  %v2103_v55 = vshll.u32 %v5296_v11, 16  ;;  %4156 = vmatpush3.bf16.msra.mxu1 %v2343_v30  ;;  %4117 = vmatprep.mubr.msk.bf16.mxu1 %vm5795_vm7, %v4446_v1  ;;  %v2101_v24 = vor.u32 %v2099_v62, %v2097_v0  ;;  %vm5806_vm5 = vmmov %vm5805_vm4 }
 0x18a   : > { %v1991_v26 = vor.u32 %v1990_v9, %v1987_v21  ;;  %v1995_v45 = vshrl.u32 %v3797_v44, 16  ;;  %v1998_v61 = vshll.u32 %v3797_v44, 16  ;;  %4199 = vmatprep.subr.bf16.mxu1 %v4446_v1  ;;  %v2107_v59 = vshrl.u32 %v5296_v11, 16  ;;  %vm5807_vm3 = vmmov %vm5804_vm2  ;;  %v3733_v19 = vld [vmem:[%s5735_s3 + $0x14] sm:$0xf] }
 0x18b   : > { %v1867_v36 = vsel %vm5289_vm8, %v1656_v17, 0.0  ;;  %v2105_v53 = vrot.slane %v2103_v55, 1  ;;  %4144 = vmatmul.mubr.msk.bf16.gmra.mxu0 %vm2131_vm9, %v5296_v11  ;;  %v5353_v22 = vcombine.low %v2428_v14, %v5342_v29  ;;  %v2470_v25 = vrot.slane %v5344_v40, 1  ;;  %v2310_v9 = vld [vmem:[#allocation2] sm:$0xe]  ;;  %vm5813_vm13 = vmmov %vm5809_vm11 }
 0x18c   : > { %v1992_v38 = vsel %vm5178_vm0, %v1983_v60, %v1991_v26  ;;  %v3798_v18 = vpack.c.bf16 %v1867_v36, %v1867_v36  ;;  %v1997_v52 = vrot.slane %v1995_v45, 6  ;;  %v2000_v48 = vrot.slane %v1998_v61, 7  ;;  %4147 = vmatprep.mubr.msk.bf16.mxu0 %vm5795_vm7, %v4446_v1  ;;  %v5367_v39 = vld [vmem:[#allocation2 + $0x14] sm:$0xff]  }
 0x18d   : > { %2037 = vst.msk [vmem:[#allocation2 + $0x20] sm:$0xf] %vm5803_vm15, %v1992_v38  ;;  %v1993_v2 = vrot.slane %v1991_v26, 4  ;;  %v2106_v63 = vsel %vm5804_vm2, %v2101_v24, %v2105_v53  ;;  %v2109_v34 = vor.u32 %v2107_v59, %v2105_v53  ;;  %v2469_v15 = vrot.slane %v5353_v22, 1  ;;  %v3726_v26 = vld [vmem:[%s5735_s3 + $0x10] sm:$0xf] }
 0x18e   : > { %v2005_v20 = vshrl.u32 %v3798_v18, 16  ;;  %v2008_v23 = vshll.u32 %v3798_v18, 16  ;;  %v2001_v37 = vor.u32 %v2000_v48, %v1997_v52  ;;  %v2775_v0 = vsel %vm5809_vm11, %v3733_v19, 0  ;;  %v3740_v14 = vld [vmem:[%s5735_s3 + $0x18] sm:$0xf] }
 0x18f   : > { %vm5810_vm12 = vcmask 1046528   ;;  %v2472_v21 = vrot.slane %v5367_v39, 1  ;;  %v3708_v44 = vcombine.low %v2310_v9, %v5208_v4  ;;  %v2317_v60 = vrot.slane %v5269_v12, 1 }
 0x190   : > { %v2007_v57 = vrot.slane %v2005_v20, 6  ;;  %v2010_v27 = vrot.slane %v2008_v23, 7  ;;  %v5316_v51 = vld [vmem:[#allocation2 + $0x18] sm:$0xff]   ;;  %v2002_v13 = vsel %vm5178_vm0, %v1993_v2, %v2001_v37  ;;  %v2003_v58 = vrot.slane %v2001_v37, 4  ;;  %4118 = vmatmul.mubr.msk.bf16.gmra.mxu1 %vm2131_vm9, %v2106_v63  ;;  %vm5812_vm1 = vmmov %vm5810_vm12  ;;  %v2741_v2 = vld [vmem:[#allocation2 + $0x4] sm:$0xc] }
 0x191   : > { %2038 = vst.msk [vmem:[#allocation2 + $0x24] sm:$0xf] %vm5805_vm4, %v2002_v13  ;;  %v2111_v56 = vshll.u32 %v5316_v51, 16  ;;  %4121 = vmatprep.mubr.msk.bf16.mxu1 %vm5795_vm7, %v4446_v1  ;;  %v2115_v42 = vshrl.u32 %v5316_v51, 16  ;;  %v2471_v41 = vsel %vm5810_vm12, %v2469_v15, %v2470_v25  ;;  %v2473_v17 = vsel %vm5812_vm1, %v2470_v25, %v2472_v21  ;;  %vm5814_vm14 = vmmov %vm5812_vm1 }
 0x192   : > { %v2011_v32 = vor.u32 %v2010_v27, %v2007_v57  ;;  %v2316_v55 = vrot.slane %v3708_v44, 1  ;;  %v2656_v45 = vsel %vm5813_vm13, %v3726_v26, 0  ;;  %vm5815_vm15 = vmmov %vm5812_vm1  ;;  %v2319_v62 = vrot.slane %v5296_v11, 1  ;;  %v3752_v57 = vld [vmem:[%s5735_s3 + $0x1c] sm:$0xf] }
 0x193   : > { %v2113_v47 = vrot.slane %v2111_v56, 1  ;;  %4148 = vmatmul.mubr.msk.bf16.gmra.mxu0 %vm2131_vm9, %v5316_v51  ;;  %vm5817_vm10 = vmmov %vm5812_vm1  ;;  %v2321_v48 = vrot.slane %v5316_v51, 1  ;;  %v3734_v37 = vcombine.low %v2741_v2, %v5342_v29  ;;  %v2749_v63 = vrot.slane %v5344_v40, 2 }
 0x194   : > { %v2012_v28 = vsel %vm5178_vm0, %v2003_v58, %v2011_v32  ;;  %v2013_v3 = vrot.slane %v2011_v32, 4  ;;  %4151 = vmatprep.mubr.msk.bf16.mxu0 %vm5795_vm7, %v4446_v1  ;;  %vm5808_vm0 = vmmov %vm5804_vm2  ;;  %v5381_v5 = vld [vmem:[#allocation2 + $0x1c] sm:$0xff]   ;;  %v2318_v61 = vsel %vm5814_vm14, %v2316_v55, %v2317_v60  ;;  %v2596_v56 = vshrl.u32 %v5344_v40, 16 }
 0x195   : > { %2039 = vst.msk [vmem:[#allocation2 + $0x28] sm:$0xf] %vm5806_vm5, %v2012_v28  ;;  %v2114_v31 = vsel %vm5807_vm3, %v2109_v34, %v2113_v47  ;;  %v2117_v43 = vor.u32 %v2115_v42, %v2113_v47  ;;  %vm5811_vm8 = vmmov %vm5808_vm0  ;;  %v2474_v4 = vrot.slane %v5381_v5, 1  ;;  %vm2747_vm3 = vcmask 1045504  }
 0x196   : > { %v2043_v6 = vsel %vm2041_vm6, %v2013_v3, %v2042_v33  ;;  %vm5816_vm2 = vmmov %vm5812_vm1  ;;  %v2748_v51 = vrot.slane %v3734_v37, 2  ;;  %v2599_v33 = vshll.u32 %v5344_v40, 16  ;;  %v2588_v59 = vshrl.u32 %v5353_v22, 16 }
 0x197   : > { %2044 = vst [vmem:[#allocation2 + $0x2c] sm:$0x3] %v2043_v6  ;;  %v2475_v12 = vsel %vm5815_vm15, %v2472_v21, %v2474_v4  ;;  %v2320_v18 = vsel %vm5816_vm2, %v2317_v60, %v2319_v62  ;;  %vm5818_vm4 = vmmov %vm5812_vm1  ;;  %v2591_v28 = vshll.u32 %v5353_v22, 16  ;;  %v2751_v3 = vrot.slane %v5367_v39, 2  ;;  %v2860_v60 = vld [vmem:[#allocation2 + $0x8] sm:$0xc] }
 0x198   : > { %v5335_v35 = vld [vmem:[#allocation2 + $0x20] sm:$0xff]   ;;  %4122 = vmatmul.mubr.msk.bf16.gmra.mxu1 %vm2131_vm9, %v2114_v31  ;;  %v2322_v24 = vsel %vm5818_vm4, %v2319_v62, %v2321_v48  ;;  %vm5819_vm6 = vmmov %vm5812_vm1  ;;  %v2750_v58 = vsel %vm2747_vm3, %v2748_v51, %v2749_v63  ;;  %v2598_v34 = vrot.slane %v2596_v56, 1  ;;  %v2601_v6 = vrot.slane %v2599_v33, 2 }
 0x199   : > { %4125 = vmatprep.mubr.msk.bf16.mxu1 %vm5795_vm7, %v4446_v1  ;;  %v2119_v10 = vshll.u32 %v5335_v35, 16  ;;  %v2123_v8 = vshrl.u32 %v5335_v35, 16  ;;  %v2323_v23 = vrot.slane %v5335_v35, 1  ;;  %vm5820_vm5 = vmmov %vm5812_vm1  ;;  %v2590_v31 = vrot.slane %v2588_v59, 1 }
 0x19a   : > { %v2752_v42 = vsel %vm2747_vm3, %v2749_v63, %v2751_v3  ;;  %v2605_v29 = vshrl.u32 %v5367_v39, 16  ;;  %v2608_v40 = vshll.u32 %v5367_v39, 16  ;;  %v2614_v15 = vshrl.u32 %v5381_v5, 16 }
 0x19b   : > { %4152 = vmatmul.mubr.msk.bf16.gmra.mxu0 %vm2131_vm9, %v5335_v35  ;;  %v2121_v49 = vrot.slane %v2119_v10, 1  ;;  %v2324_v27 = vsel %vm5820_vm5, %v2321_v48, %v2323_v23  ;;  %v2593_v35 = vrot.slane %v2591_v28, 2  ;;  %v2602_v10 = vor.u32 %v2601_v6, %v2598_v34  ;;  %v5497_v48 = vld [vmem:[#allocation2 + $0x18] sm:$0xff]  }
 0x19c   : > { %v5346_v54 = vld [vmem:[#allocation2 + $0x28] ss:$0 sps:$4 sm:$0x11]   ;;  %4179 = vmatprep.mubr.msk.bf16.mxu0 %vm5795_vm7, %v4446_v1  ;;  %v2610_v25 = vrot.slane %v2608_v40, 2  ;;  %v3038_v63 = vshrl.u32 %v5497_v48, 16  ;;  %vm5828_vm2 = vcmask 1041408  }
 0x19d   : > { %v2122_v16 = vsel %vm5808_vm0, %v2117_v43, %v2121_v49  ;;  %v2127_v50 = vshll.u32 %v5346_v54, 16  ;;  %v2125_v7 = vor.u32 %v2123_v8, %v2121_v49  ;;  %v5397_v36 = vld [vmem:[#allocation2 + $0x24] sm:$0xff]   ;;  %vm5821_vm0 = vmmov %vm5809_vm11  ;;  %v2325_v32 = vrot.slane %v5346_v54, 1 }
 0x19e   : > { %v2476_v38 = vrot.slane %v5397_v36, 1  ;;  %v4422_v52 = vld [vmem:[#allocation2 + $0x2c] ss:$0 sps:$4 sm:$0x11]   ;;  %v3089_v13 = vsel %vm5821_vm0, %v3752_v57, 0  ;;  %vm5822_vm11 = vmmov %vm5812_vm1  ;;  %v2594_v54 = vor.u32 %v2593_v35, %v2590_v31  ;;  %v2753_v49 = vrot.slane %v5381_v5, 2 }
 0x19f   : > { %v2129_v46 = vrot.slane %v2127_v50, 1  ;;  %v2478_v11 = vrot.slane %v4422_v52, 1  ;;  %v2326_v47 = vsel %vm5822_vm11, %v2323_v23, %v2325_v32  ;;  %vm5823_vm12 = vmmov %vm5821_vm0  ;;  %v2616_v8 = vrot.slane %v2614_v15, 1  ;;  %v4424_v9 = vld [vmem:[#allocation2 + $0x2c] ss:$0 sps:$4 sm:$0x33]  }
 0x1a0   : > { %4126 = vmatmul.mubr.msk.bf16.gmra.mxu1 %vm2131_vm9, %v2122_v16  ;;  %v2477_v53 = vsel %vm5817_vm10, %v2474_v4, %v2476_v38  ;;  %v2928_v43 = vsel %vm5823_vm12, %v3740_v14, 0  ;;  %v2607_v16 = vrot.slane %v2605_v29, 1  ;;  %v2754_v19 = vsel %vm2747_vm3, %v2751_v3, %v2753_v49  ;;  %v5513_v3 = vld [vmem:[#allocation2 + $0x20] sm:$0xff]   ;;  %v5525_v29 = vld [vmem:[#allocation2 + $0x28] sm:$0xff]   ;;  %vm5830_vm4 = vmmov %vm5821_vm0 }
 0x1a1   : > { %4129 = vmatprep.mubr.msk.bf16.mxu1 %vm5795_vm7, %v4446_v1  ;;  %v2130_v30 = vsel %vm5811_vm8, %v2125_v7, %v2129_v46  ;;  %v2479_v20 = vsel %vm5819_vm6, %v2476_v38, %v2478_v11  ;;  %vm5824_vm8 = vsmask.f32 6400  ;;  %v5475_v7 = vld [vmem:[#allocation2 + $0xc] sm:$0xf]  ;;  %v2757_v55 = vrot.slane %v4424_v9, 2 }
 0x1a2   : > { %v2603_v22 = vsel %vm5824_vm8, %v2594_v54, %v2602_v10  ;;  %v2611_v50 = vor.u32 %v2610_v25, %v2607_v16  ;;  %vm5825_vm1 = vmmov %vm5824_vm8  ;;  %v5486_v26 = vcombine.low %v2860_v60, %v5475_v7  ;;  %v3041_v57 = vshll.u32 %v5497_v48, 16  ;;  %v3759_v54 = vld [vmem:[%s5735_s3 + $0x20] sm:$0xf] }
 0x1a3   : > { %4180 = vmatmul.mubr.msk.bf16.vlgmr.msra.gmra.mxu0 %vm2131_vm9, %v2471_v41  ;;  %v2755_v41 = vrot.slane %v5397_v36, 2  ;;  %vm5826_vm13 = vmmov %vm5825_vm1  ;;  %vm3019_vm15 = vsmask.f32 5376  ;;  %v3040_v59 = vrot.slane %v3038_v63, 2  ;;  %v3047_v6 = vshrl.u32 %v5513_v3, 16  ;;  %v4437_v63 = vld [vmem:[%s4516_s8 + $0xbc] sm:$0xff]  }
 0x1a4   : > { %4183 = vmatprep.mubr.msk.bf16.mxu0 %vm5795_vm7, %v4446_v1  ;;  %4222 = vmatpush3.bf16.msra.mxu0 %v2775_v0  ;;  %v2617_v0 = vshll.u32 %v5381_v5, 16  ;;  %v2612_v39 = vsel %vm5825_vm1, %v2602_v10, %v2611_v50  ;;  %v2626_v5 = vshll.u32 %v5397_v36, 16  ;;  %v3024_v38 = vshll.u32 %v5486_v26, 16  ;;  %vm5827_vm14 = vmmov %vm5825_vm1 }
 0x1a5   : > { %4265 = vmatprep.subr.bf16.mxu0 %v4446_v1  ;;  %v2756_v21 = vsel %vm2747_vm3, %v2753_v49, %v2755_v41  ;;  %v3043_v28 = vrot.slane %v3041_v57, 3  ;;  %v3050_v31 = vshll.u32 %v5513_v3, 16  ;;  %vm5829_vm10 = vmmov %vm5825_vm1  ;;  %v3049_v10 = vrot.slane %v3047_v6, 2 }
 0x1a6   : > { %v2619_v46 = vrot.slane %v2617_v0, 2  ;;  %v2628_v62 = vrot.slane %v2626_v5, 2  ;;  %v3026_v2 = vrot.slane %v3024_v38, 3  ;;  %v3208_v49 = vsel %vm5830_vm4, %v3759_v54, 0 }
 0x1a7   : > { %v3044_v34 = vor.u32 %v3043_v28, %v3040_v59  ;;  %v3052_v14 = vrot.slane %v3050_v31, 3  ;;  %v3056_v16 = vshrl.u32 %v5525_v29, 16  ;;  %v3059_v25 = vshll.u32 %v5525_v29, 16 }
 0x1a8   : > { %4130 = vmatmul.mubr.msk.bf16.gmra.mxu1 %vm2131_vm9, %v2130_v30  ;;  %v5478_v30 = vld [vmem:[#allocation2 + $0x10] sm:$0xff]   ;;  %v2620_v44 = vor.u32 %v2619_v46, %v2616_v8  ;;  %v2906_v60 = vrot.slane %v5513_v3, 2  ;;  %vm5831_vm6 = vcmask 31744   ;;  %vm3180_vm0 = vcmask 1044480  }
 0x1a9   : > { %4157 = vmatprep.mubr.msk.bf16.mxu1 %vm5795_vm7, %v4446_v1  ;;  %v3032_v4 = vshll.u32 %v5478_v30, 16  ;;  %v2902_v40 = vrot.slane %v5478_v30, 2  ;;  %v3058_v15 = vrot.slane %v3056_v16, 2  ;;  %v3061_v0 = vrot.slane %v3059_v25, 3  ;;  %vm5832_vm5 = vmmov %vm5831_vm6 }
 0x1ab   : > { %4184 = vmatmul.mubr.msk.bf16.gmra.mxu0 %vm2131_vm9, %v2473_v17  ;;  %v2623_v17 = vshrl.u32 %v5397_v36, 16  ;;  %v3021_v36 = vshrl.u32 %v5486_v26, 16  ;;  %v3034_v52 = vrot.slane %v3032_v4, 3  ;;  %v3062_v8 = vor.u32 %v3061_v0, %v3058_v15 }
 0x1ac   : > { %4187 = vmatprep.mubr.msk.bf16.mxu0 %vm5795_vm7, %v4446_v1  ;;  %v2908_v4 = vrot.slane %v5525_v29, 2 }
 0x1ad   : > { %v3023_v23 = vrot.slane %v3021_v36, 2 }
 0x1af   : > { %v3027_v32 = vor.u32 %v3026_v2, %v3023_v23  ;;  %v4435_v23 = vld [vmem:[%s4516_s8 + $0xac] sm:$0xff]   ;;  %v4436_v2 = vld [vmem:[%s4516_s8 + $0xb4] sm:$0xff]  }
 0x1b0   : > { %4158 = vmatmul.mubr.msk.bf16.vlgmr.msra.gmra.mxu1 %vm2131_vm9, %v2318_v61  ;;  %v2621_v61 = vsel %vm5826_vm13, %v2611_v50, %v2620_v44 }
 0x1b1   : > { %4200 = vmatpush3.bf16.msra.mxu1 %v2656_v45  ;;  %4161 = vmatprep.mubr.msk.bf16.mxu1 %vm5795_vm7, %v4446_v1  ;;  %v3029_v45 = vshrl.u32 %v5478_v30, 16 }
 0x1b2   : > { %4243 = vmatprep.subr.bf16.mxu1 %v4446_v1 }
 0x1b3   : > { %4188 = vmatmul.mubr.msk.bf16.gmra.mxu0 %vm2131_vm9, %v2475_v12  ;;  %v2625_v12 = vrot.slane %v2623_v17, 1 }
 0x1b4   : > { %4191 = vmatprep.mubr.msk.bf16.mxu0 %vm5795_vm7, %v4446_v1 }
 0x1b5   : > { %v2629_v11 = vor.u32 %v2628_v62, %v2625_v12  ;;  %v4431_v12 = vld [vmem:[#allocation2 + $0x30] ss:$0 sps:$4 sm:$0x33]   ;;  %v4432_v62 = vld [vmem:[%s4516_s8 + $0x9c] sm:$0xff]  }
 0x1b6   : > { %v2910_v36 = vrot.slane %v4431_v12, 2 }
 0x1b7   : > { %v2630_v51 = vsel %vm5827_vm14, %v2620_v44, %v2629_v11 }
 0x1b8   : > { %4162 = vmatmul.mubr.msk.bf16.gmra.mxu1 %vm2131_vm9, %v2320_v18  ;;  %v2758_v18 = vsel %vm2747_vm3, %v2755_v41, %v2757_v55  ;;  %v5543_v41 = vld [vmem:[#allocation2 + $0x30] ss:$0 sps:$4 sm:$0x77]   ;;  %v2911_v38 = vsel %vm2747_vm3, %v2908_v4, %v2910_v36 }
 0x1b9   : > { %4165 = vmatprep.mubr.msk.bf16.mxu1 %vm5795_vm7, %v4446_v1  ;;  %v3065_v46 = vshrl.u32 %v5543_v41, 16 }
 0x1bb   : > { %4192 = vmatmul.mubr.msk.bf16.gmra.mxu0 %vm2131_vm9, %v2477_v53  ;;  %v3031_v53 = vrot.slane %v3029_v45, 2  ;;  %v3067_v17 = vrot.slane %v3065_v46, 2 }
 0x1bc   : > { %4195 = vmatprep.mubr.msk.bf16.mxu0 %vm5795_vm7, %v4446_v1 }
 0x1bd   : > { %v3035_v37 = vor.u32 %v3034_v52, %v3031_v53  ;;  %v3174_v53 = vld [vmem:[#allocation2 + $0x8] sm:$0x8] }
 0x1be   : > { %v3760_v52 = vcombine.low %v3174_v53, %v5475_v7  ;;  %v3184_v7 = vrot.slane %v5497_v48, 3 }
 0x1bf   : > { %v3036_v33 = vsel %vm3019_vm15, %v3027_v32, %v3035_v37 }
 0x1c0   : > { %4166 = vmatmul.mubr.msk.bf16.gmra.mxu1 %vm2131_vm9, %v2322_v24  ;;  %v2632_v24 = vshrl.u32 %v4424_v9, 16 }
 0x1c1   : > { %4169 = vmatprep.mubr.msk.bf16.mxu1 %vm5795_vm7, %v4446_v1 }
 0x1c3   : > { %4196 = vmatmul.mubr.msk.bf16.gmra.mxu0 %vm2131_vm9, %v2479_v20  ;;  %v2635_v20 = vshll.u32 %v4424_v9, 16 }
 0x1c4   : > { %4223 = vmatprep.mubr.msk.bf16.mxu0 %vm5795_vm7, %v4446_v1 }
 0x1c8   : > { %4170 = vmatmul.mubr.msk.bf16.gmra.mxu1 %vm2131_vm9, %v2324_v27  ;;  %v3303_v27 = vld [vmem:[%s5736_s4] sm:$0x3] }
 0x1c9   : > { %4173 = vmatprep.mubr.msk.bf16.mxu1 %vm5795_vm7, %v4446_v1  ;;  %v3345_v56 = vsel %vm5828_vm2, %v3303_v27, 0  ;;  %v3188_v27 = vrot.slane %v5525_v29, 3 }
 0x1cb   : > { %4224 = vmatmul.mubr.msk.bf16.vlgmr.msra.gmra.mxu0 %vm2131_vm9, %v2750_v58  ;;  %v2637_v58 = vrot.slane %v2635_v20, 2 }
 0x1cc   : > { %4227 = vmatprep.mubr.msk.bf16.mxu0 %vm5795_vm7, %v4446_v1  ;;  %4266 = vmatpush3.bf16.msra.mxu0 %v3089_v13  ;;  %v2634_v13 = vrot.slane %v2632_v24, 1  ;;  %v3181_v24 = vrot.slane %v3760_v52, 3 }
 0x1cd   : > { %4309 = vmatprep.subr.bf16.mxu0 %v4446_v1 }
 0x1d0   : > { %4174 = vmatmul.mubr.msk.bf16.gmra.mxu1 %vm2131_vm9, %v2326_v47  ;;  %v2638_v47 = vor.u32 %v2637_v58, %v2634_v13 }
 0x1d1   : > { %4201 = vmatprep.mubr.msk.bf16.mxu1 %vm5795_vm7, %v4446_v1 }
 0x1d2   : > { %v2639_v35 = vsel %vm5829_vm10, %v2629_v11, %v2638_v47  ;;  %v3182_v11 = vrot.slane %v5478_v30, 3 }
 0x1d3   : > { %4228 = vmatmul.mubr.msk.bf16.gmra.mxu0 %vm2131_vm9, %v2752_v42  ;;  %v3045_v42 = vsel %vm3019_vm15, %v3035_v37, %v3044_v34  ;;  %v3186_v37 = vrot.slane %v5513_v3, 3 }
 0x1d4   : > { %4231 = vmatprep.mubr.msk.bf16.mxu0 %vm5795_vm7, %v4446_v1  ;;  %v3183_v20 = vsel %vm3180_vm0, %v3181_v24, %v3182_v11  ;;  %v3185_v30 = vsel %vm3180_vm0, %v3182_v11, %v3184_v7 }
 0x1d5   : > { %v3189_v58 = vsel %vm3180_vm0, %v3186_v37, %v3188_v27 }
 0x1d8   : > { %4202 = vmatmul.mubr.msk.bf16.vlgmr.msra.gmra.mxu1 %vm2131_vm9, %v2603_v22  ;;  %v3053_v22 = vor.u32 %v3052_v14, %v3049_v10 }
 0x1d9   : > { %4244 = vmatpush3.bf16.msra.mxu1 %v2928_v43  ;;  %4205 = vmatprep.mubr.msk.bf16.mxu1 %vm5795_vm7, %v4446_v1  ;;  %v2901_v43 = vrot.slane %v5486_v26, 2 }
 0x1da   : > { %4287 = vmatprep.subr.bf16.mxu1 %v4446_v1  ;;  %v3054_v50 = vsel %vm3019_vm15, %v3044_v34, %v3053_v22  ;;  %v3063_v44 = vsel %vm3019_vm15, %v3053_v22, %v3062_v8 }
 0x1db   : > { %4232 = vmatmul.mubr.msk.bf16.gmra.mxu0 %vm2131_vm9, %v2754_v19  ;;  %v2903_v19 = vsel %vm2747_vm3, %v2901_v43, %v2902_v40 }
 0x1dc   : > { %4235 = vmatprep.mubr.msk.bf16.mxu0 %vm5795_vm7, %v4446_v1 }
 0x1e0   : > { %4206 = vmatmul.mubr.msk.bf16.gmra.mxu1 %vm2131_vm9, %v2612_v39  ;;  %v2904_v39 = vrot.slane %v5497_v48, 2  ;;  %v3187_v48 = vsel %vm3180_vm0, %v3184_v7, %v3186_v37 }
 0x1e1   : > { %4209 = vmatprep.mubr.msk.bf16.mxu1 %vm5795_vm7, %v4446_v1 }
 0x1e2   : > { %v2905_v9 = vsel %vm2747_vm3, %v2902_v40, %v2904_v39  ;;  %v2907_v55 = vsel %vm2747_vm3, %v2904_v39, %v2906_v60 }
 0x1e3   : > { %4236 = vmatmul.mubr.msk.bf16.gmra.mxu0 %vm2131_vm9, %v2756_v21  ;;  %v3068_v21 = vshll.u32 %v5543_v41, 16 }
 0x1e4   : > { %4239 = vmatprep.mubr.msk.bf16.mxu0 %vm5795_vm7, %v4446_v1 }
 0x1e5   : > { %v3070_v5 = vrot.slane %v3068_v21, 3 }
 0x1e7   : > { %v3071_v26 = vor.u32 %v3070_v5, %v3067_v17 }
 0x1e8   : > { %4210 = vmatmul.mubr.msk.bf16.gmra.mxu1 %vm2131_vm9, %v2621_v61  ;;  %v2909_v61 = vsel %vm2747_vm3, %v2906_v60, %v2908_v4  ;;  %vm5833_vm3 = vmmov %vm5832_vm5 }
 0x1e9   : > { %4213 = vmatprep.mubr.msk.bf16.mxu1 %vm5795_vm7, %v4446_v1  ;;  %v3072_v45 = vsel %vm3019_vm15, %v3062_v8, %v3071_v26  ;;  %vm5834_vm11 = vmmov %vm5833_vm3 }
 0x1ea   : > { %vm5835_vm12 = vmmov %vm5833_vm3 }
 0x1eb   : > { %4240 = vmatmul.mubr.msk.bf16.gmra.mxu0 %vm2131_vm9, %v2758_v18  ;;  %v4434_v18 = vld [vmem:[%s4516_s8 + $0xa4] sm:$0xff]   ;;  %s4334_s8 = smul.u32 80, %s5837_s22 }
 0x1ec   : > { %4267 = vmatprep.mubr.msk.bf16.mxu0 %vm5795_vm7, %v4446_v1 }
 0x1ed   : > { %s5679_s22 = scalar_lea.vmem %s5738_s6, %s4334_s8 }
 0x1f0   : > { %4214 = vmatmul.mubr.msk.bf16.gmra.mxu1 %vm2131_vm9, %v2630_v51 }
 0x1f1   : > { %4217 = vmatprep.mubr.msk.bf16.mxu1 %vm5795_vm7, %v4446_v1 }
 0x1f3   : > { %4268 = vmatmul.mubr.msk.bf16.vlgmr.msra.gmra.mxu0 %vm2131_vm9, %v3036_v33  ;;  %v3190_v33 = vrot.slane %v5543_v41, 3 }
 0x1f4   : > { %4271 = vmatprep.mubr.msk.bf16.mxu0 %vm5795_vm7, %v4446_v1  ;;  %4310 = vmatpush3.bf16.msra.mxu0 %v3345_v56 }
 0x1f5   : > { %v3191_v3 = vsel %vm3180_vm0, %v3188_v27, %v3190_v33 }
 0x1f8   : > { %4218 = vmatmul.mubr.msk.bf16.gmra.mxu1 %vm2131_vm9, %v2639_v35 }
 0x1f9   : > { %4245 = vmatprep.mubr.msk.bf16.mxu1 %vm5795_vm7, %v4446_v1 }
 0x1fb   : > { %4272 = vmatmul.mubr.msk.bf16.gmra.mxu0 %vm2131_vm9, %v3045_v42 }
 0x1fc   : > { %4275 = vmatprep.mubr.msk.bf16.mxu0 %vm5795_vm7, %v4446_v1 }
 0x200   : > { %4246 = vmatmul.mubr.msk.bf16.vlgmr.msra.gmra.mxu1 %vm2131_vm9, %v2903_v19 }
 0x201   : > { %4288 = vmatpush3.bf16.msra.mxu1 %v3208_v49  ;;  %4249 = vmatprep.mubr.msk.bf16.mxu1 %vm5795_vm7, %v4446_v1 }
 0x203   : > { %4276 = vmatmul.mubr.msk.bf16.gmra.mxu0 %vm2131_vm9, %v3054_v50 }
 0x204   : > { %4279 = vmatprep.mubr.msk.bf16.mxu0 %vm5795_vm7, %v4446_v1 }
 0x208   : > { %4250 = vmatmul.mubr.msk.bf16.gmra.mxu1 %vm2131_vm9, %v2905_v9 }
 0x209   : > { %4253 = vmatprep.mubr.msk.bf16.mxu1 %vm5795_vm7, %v4446_v1 }
 0x20b   : > { %4280 = vmatmul.mubr.msk.bf16.gmra.mxu0 %vm2131_vm9, %v3063_v44 }
 0x20c   : > { %4283 = vmatprep.mubr.msk.bf16.mxu0 %vm5795_vm7, %v4446_v1 }
 0x210   : > { %4254 = vmatmul.mubr.msk.bf16.gmra.mxu1 %vm2131_vm9, %v2907_v55 }
 0x211   : > { %4257 = vmatprep.mubr.msk.bf16.mxu1 %vm5795_vm7, %v4446_v1 }
 0x213   : > { %4284 = vmatmul.mubr.msk.bf16.gmra.mxu0 %vm2131_vm9, %v3072_v45 }
 0x214   : > { %4311 = vmatprep.mubr.msk.bf16.mxu0 %vm5795_vm7, %v4446_v1 }
 0x218   : > { %4258 = vmatmul.mubr.msk.bf16.gmra.mxu1 %vm2131_vm9, %v2909_v61 }
 0x219   : > { %4261 = vmatprep.mubr.msk.bf16.mxu1 %vm5795_vm7, %v4446_v1 }
 0x21b   : > { %4312 = vmatmul.mubr.msk.bf16.vlgmr.msra.gmra.mxu0 %vm5831_vm6, %v4432_v62 }
 0x21c   : > { %4315 = vmatprep.mubr.msk.bf16.mxu0 %vm5795_vm7, %v4446_v1 }
 0x220   : > { %4262 = vmatmul.mubr.msk.bf16.gmra.mxu1 %vm2131_vm9, %v2911_v38 }
 0x221   : > { %4289 = vmatprep.mubr.msk.bf16.mxu1 %vm5795_vm7, %v4446_v1 }
 0x223   : > { %4316 = vmatmul.mubr.msk.bf16.gmra.mxu0 %vm5832_vm5, %v4434_v18 }
 0x224   : > { %4319 = vmatprep.mubr.msk.bf16.mxu0 %vm5795_vm7, %v4446_v1 }
 0x228   : > { %4290 = vmatmul.mubr.msk.bf16.vlgmr.msra.gmra.mxu1 %vm2131_vm9, %v3183_v20 }
 0x229   : > { %4293 = vmatprep.mubr.msk.bf16.mxu1 %vm5795_vm7, %v4446_v1 }
 0x22b   : > { %4320 = vmatmul.mubr.msk.bf16.gmra.mxu0 %vm5833_vm3, %v4435_v23 }
 0x22c   : > { %4323 = vmatprep.mubr.msk.bf16.mxu0 %vm5795_vm7, %v4446_v1 }
 0x230   : > { %4294 = vmatmul.mubr.msk.bf16.gmra.mxu1 %vm2131_vm9, %v3185_v30 }
 0x231   : > { %4297 = vmatprep.mubr.msk.bf16.mxu1 %vm5795_vm7, %v4446_v1 }
 0x233   : > { %4324 = vmatmul.mubr.msk.bf16.gmra.mxu0 %vm5834_vm11, %v4436_v2 }
 0x234   : > { %4327 = vmatprep.mubr.msk.bf16.mxu0 %vm5795_vm7, %v4446_v1 }
 0x238   : > { %4298 = vmatmul.mubr.msk.bf16.gmra.mxu1 %vm2131_vm9, %v3187_v48 }
 0x239   : > { %4301 = vmatprep.mubr.msk.bf16.mxu1 %vm5795_vm7, %v4446_v1 }
 0x23b   : > { %v2271_v57 = vpop.f32.mrf.mxu0  ;;  %4328 = vmatmul.mubr.msk.bf16.gmra.mxu0 %vm5835_vm12, %v4437_v63 }
 0x23d   : > { %v4137_v51 = vpop.f32.mrf.mxu0 }
 0x23f   : > { %v2274_v13 = vpop.f32.mrf.mxu0 }
 0x240   : > { %4302 = vmatmul.mubr.msk.bf16.gmra.mxu1 %vm2131_vm9, %v3189_v58 }
 0x241   : > { %v4138_v32 = vpop.f32.mrf.mxu0  ;;  %4305 = vmatprep.mubr.msk.bf16.mxu1 %vm5795_vm7, %v4446_v1 }
 0x243   : > { %v2279_v56 = vpop.f32.mrf.mxu0 }
 0x245   : > { %v4141_v59 = vpop.f32.mrf.mxu0 }
 0x247   : > { %v2282_v28 = vpop.f32.mrf.mxu0 }
 0x248   : > { %v2185_v47 = vpop.f32.mrf.mxu1  ;;  %4306 = vmatmul.mubr.msk.bf16.gmra.mxu1 %vm2131_vm9, %v3191_v3 }
 0x249   : > { %v2272_v34 = vadd.f32 %v2271_v57, %v2185_v47  ;;  %v4142_v6 = vpop.f32.mrf.mxu0 }
 0x24a   : > { %v4115_v31 = vpop.f32.mrf.mxu1 }
 0x24b   : > { %v2287_v35 = vpop.f32.mrf.mxu0 }
 0x24c   : > { %v2188_v42 = vpop.f32.mrf.mxu1 }
 0x24d   : > { %v2275_v10 = vadd.f32 %v2274_v13, %v2188_v42  ;;  %v4145_v14 = vpop.f32.mrf.mxu0 }
 0x24e   : > { %v4116_v29 = vpop.f32.mrf.mxu1 }
 0x24f   : > { %v2290_v40 = vpop.f32.mrf.mxu0 }
 0x250   : > { %v2193_v1 = vpop.f32.mrf.mxu1 }
 0x251   : > { %v2280_v54 = vadd.f32 %v2279_v56, %v2193_v1  ;;  %v4146_v43 = vpop.f32.mrf.mxu0 }
 0x252   : > { %v4119_v49 = vpop.f32.mrf.mxu1 }
 0x253   : > { %v2295_v22 = vpop.f32.mrf.mxu0 }
 0x254   : > { %v2196_v16 = vpop.f32.mrf.mxu1 }
 0x255   : > { %v2283_v25 = vadd.f32 %v2282_v28, %v2196_v16  ;;  %v4149_v19 = vpop.f32.mrf.mxu0 }
 0x256   : > { %v4120_v50 = vpop.f32.mrf.mxu1 }
 0x257   : > { %v2298_v15 = vpop.f32.mrf.mxu0 }
 0x258   : > { %v2201_v0 = vpop.f32.mrf.mxu1 }
 0x259   : > { %v2288_v41 = vadd.f32 %v2287_v35, %v2201_v0  ;;  %v4150_v39 = vpop.f32.mrf.mxu0 }
 0x25a   : > { %v4123_v8 = vpop.f32.mrf.mxu1 }
 0x25b   : > { %v2303_v46 = vpop.f32.mrf.mxu0 }
 0x25c   : > { %v2204_v21 = vpop.f32.mrf.mxu1 }
 0x25d   : > { %v2291_v9 = vadd.f32 %v2290_v40, %v2204_v21  ;;  %v4153_v44 = vpop.f32.mrf.mxu0 }
 0x25e   : > { %v4124_v17 = vpop.f32.mrf.mxu1 }
 0x25f   : > { %v2306_v5 = vpop.f32.mrf.mxu0 }
 0x260   : > { %v2209_v60 = vpop.f32.mrf.mxu1 }
 0x261   : > { %v2296_v26 = vadd.f32 %v2295_v22, %v2209_v60  ;;  %v4154_v55 = vpop.f32.mrf.mxu0 }
 0x262   : > { %v4127_v45 = vpop.f32.mrf.mxu1 }
 0x263   : > { %v2532_v4 = vpop.f32.mrf.mxu0 }
 0x264   : > { %v2212_v61 = vpop.f32.mrf.mxu1 }
 0x265   : > { %v2299_v12 = vadd.f32 %v2298_v15, %v2212_v61  ;;  %v4181_v62 = vpop.f32.mrf.mxu0 }
 0x266   : > { %v4128_v36 = vpop.f32.mrf.mxu1 }
 0x267   : > { %v2535_v38 = vpop.f32.mrf.mxu0 }
 0x268   : > { %v2217_v18 = vpop.f32.mrf.mxu1 }
 0x269   : > { %v2304_v53 = vadd.f32 %v2303_v46, %v2217_v18  ;;  %v4182_v52 = vpop.f32.mrf.mxu0 }
 0x26a   : > { %v4131_v11 = vpop.f32.mrf.mxu1 }
 0x26b   : > { %v2540_v24 = vpop.f32.mrf.mxu0 }
 0x26c   : > { %v2220_v20 = vpop.f32.mrf.mxu1 }
 0x26d   : > { %v2307_v23 = vadd.f32 %v2306_v5, %v2220_v20  ;;  %v4185_v7 = vpop.f32.mrf.mxu0 }
 0x26e   : > { %v4132_v30 = vpop.f32.mrf.mxu1 }
 0x26f   : > { %v2543_v2 = vpop.f32.mrf.mxu0 }
 0x270   : > { %v2379_v37 = vpop.f32.mrf.mxu1 }
 0x271   : > { %v2418_v48 = vadd.f32 %v2379_v37, %v2272_v34  ;;  %v4186_v63 = vpop.f32.mrf.mxu0 }
 0x272   : > { %v4159_v57 = vpop.f32.mrf.mxu1 }
 0x273   : > { %v2548_v27 = vpop.f32.mrf.mxu0  ;;  %v2571_v51 = vadd.f32 %v2532_v4, %v2418_v48 }
 0x274   : > { %v2382_v13 = vpop.f32.mrf.mxu1 }
 0x275   : > { %v2419_v58 = vadd.f32 %v2382_v13, %v2275_v10  ;;  %v4189_v32 = vpop.f32.mrf.mxu0 }
 0x276   : > { %v4160_v56 = vpop.f32.mrf.mxu1 }
 0x277   : > { %v2551_v33 = vpop.f32.mrf.mxu0  ;;  %v2572_v59 = vadd.f32 %v2535_v38, %v2419_v58 }
 0x278   : > { %v2387_v28 = vpop.f32.mrf.mxu1 }
 0x279   : > { %v2420_v3 = vadd.f32 %v2387_v28, %v2280_v54  ;;  %v4190_v47 = vpop.f32.mrf.mxu0 }
 0x27a   : > { %v4163_v6 = vpop.f32.mrf.mxu1 }
 0x27b   : > { %v2556_v31 = vpop.f32.mrf.mxu0  ;;  %v2573_v35 = vadd.f32 %v2540_v24, %v2420_v3 }
 0x27c   : > { %v2390_v42 = vpop.f32.mrf.mxu1 }
 0x27d   : > { %v2421_v14 = vadd.f32 %v2390_v42, %v2283_v25  ;;  %v4193_v29 = vpop.f32.mrf.mxu0 }
 0x27e   : > { %v4164_v34 = vpop.f32.mrf.mxu1 }
 0x27f   : > { %v2559_v40 = vpop.f32.mrf.mxu0  ;;  %v2574_v1 = vadd.f32 %v2543_v2, %v2421_v14 }
 0x280   : > { %v2395_v43 = vpop.f32.mrf.mxu1 }
 0x281   : > { %v2422_v49 = vadd.f32 %v2395_v43, %v2288_v41  ;;  %v4194_v22 = vpop.f32.mrf.mxu0 }
 0x282   : > { %v4167_v10 = vpop.f32.mrf.mxu1 }
 0x283   : > { %v2564_v16 = vpop.f32.mrf.mxu0  ;;  %v2575_v19 = vadd.f32 %v2548_v27, %v2422_v49 }
 0x284   : > { %v2398_v50 = vpop.f32.mrf.mxu1 }
 0x285   : > { %v2423_v15 = vadd.f32 %v2398_v50, %v2291_v9  ;;  %v4197_v0 = vpop.f32.mrf.mxu0 }
 0x286   : > { %v4168_v54 = vpop.f32.mrf.mxu1 }
 0x287   : > { %v2567_v39 = vpop.f32.mrf.mxu0  ;;  %v2576_v8 = vadd.f32 %v2551_v33, %v2423_v15 }
 0x288   : > { %v2403_v46 = vpop.f32.mrf.mxu1 }
 0x289   : > { %v2424_v21 = vadd.f32 %v2403_v46, %v2296_v26  ;;  %v4198_v44 = vpop.f32.mrf.mxu0 }
 0x28a   : > { %v4171_v25 = vpop.f32.mrf.mxu1 }
 0x28b   : > { %v2811_v17 = vpop.f32.mrf.mxu0  ;;  %v2577_v5 = vadd.f32 %v2556_v31, %v2424_v21 }
 0x28c   : > { %v2406_v60 = vpop.f32.mrf.mxu1 }
 0x28d   : > { %v2425_v55 = vadd.f32 %v2406_v60, %v2299_v12  ;;  %v4225_v45 = vpop.f32.mrf.mxu0 }
 0x28e   : > { %v4172_v41 = vpop.f32.mrf.mxu1 }
 0x28f   : > { %v2814_v4 = vpop.f32.mrf.mxu0  ;;  %v2578_v61 = vadd.f32 %v2559_v40, %v2425_v55 }
 0x290   : > { %v2411_v62 = vpop.f32.mrf.mxu1 }
 0x291   : > { %v2426_v36 = vadd.f32 %v2411_v62, %v2304_v53  ;;  %v4226_v38 = vpop.f32.mrf.mxu0 }
 0x292   : > { %v4175_v9 = vpop.f32.mrf.mxu1 }
 0x293   : > { %v2819_v18 = vpop.f32.mrf.mxu0  ;;  %v2579_v52 = vadd.f32 %v2564_v16, %v2426_v36 }
 0x294   : > { %v2414_v11 = vpop.f32.mrf.mxu1 }
 0x295   : > { %v2427_v24 = vadd.f32 %v2414_v11, %v2307_v23  ;;  %v4229_v20 = vpop.f32.mrf.mxu0 }
 0x296   : > { %v4176_v26 = vpop.f32.mrf.mxu1 }
 0x297   : > { %v2822_v7 = vpop.f32.mrf.mxu0  ;;  %v2580_v30 = vadd.f32 %v2567_v39, %v2427_v24 }
 0x298   : > { %v2692_v2 = vpop.f32.mrf.mxu1 }
 0x299   : > { %v2731_v37 = vadd.f32 %v2692_v2, %v2571_v51  ;;  %v4230_v48 = vpop.f32.mrf.mxu0 }
 0x29a   : > { %v4203_v12 = vpop.f32.mrf.mxu1 }
 0x29b   : > { %v2827_v63 = vpop.f32.mrf.mxu0  ;;  %v5619_v57 = vadd.f32 %v2811_v17, %v2731_v37 }
 0x29c   : > { %v2695_v27 = vpop.f32.mrf.mxu1 }
 0x29d   : > { %v2732_v13 = vadd.f32 %v2695_v27, %v2572_v59  ;;  %v4233_v53 = vpop.f32.mrf.mxu0 }
 0x29e   : > { %v4204_v58 = vpop.f32.mrf.mxu1 }
 0x29f   : > { %v2830_v32 = vpop.f32.mrf.mxu0  ;;  %v5621_v56 = vadd.f32 %v2814_v4, %v2732_v13 }
 0x2a0   : > { %v2700_v33 = vpop.f32.mrf.mxu1 }
 0x2a1   : > { %v2733_v23 = vadd.f32 %v2700_v33, %v2573_v35  ;;  %v4234_v28 = vpop.f32.mrf.mxu0 }
 0x2a2   : > { %v4207_v3 = vpop.f32.mrf.mxu1 }
 0x2a3   : > { %v2835_v47 = vpop.f32.mrf.mxu0  ;;  %v5623_v6 = vadd.f32 %v2819_v18, %v2733_v23 }
 0x2a4   : > { %v2703_v51 = vpop.f32.mrf.mxu1 }
 0x2a5   : > { %v2734_v31 = vadd.f32 %v2703_v51, %v2574_v1  ;;  %v4237_v42 = vpop.f32.mrf.mxu0 }
 0x2a6   : > { %v4208_v14 = vpop.f32.mrf.mxu1 }
 0x2a7   : > { %v2838_v29 = vpop.f32.mrf.mxu0  ;;  %v5625_v34 = vadd.f32 %v2822_v7, %v2734_v31 }
 0x2a8   : > { %v2708_v59 = vpop.f32.mrf.mxu1 }
 0x2a9   : > { %v2735_v40 = vadd.f32 %v2708_v59, %v2575_v19  ;;  %v4238_v43 = vpop.f32.mrf.mxu0 }
 0x2aa   : > { %v4211_v49 = vpop.f32.mrf.mxu1 }
 0x2ab   : > { %v2843_v22 = vpop.f32.mrf.mxu0  ;;  %v5627_v10 = vadd.f32 %v2827_v63, %v2735_v40 }
 0x2ac   : > { %v2711_v35 = vpop.f32.mrf.mxu1 }
 0x2ad   : > { %v2736_v16 = vadd.f32 %v2711_v35, %v2576_v8  ;;  %v4241_v50 = vpop.f32.mrf.mxu0 }
 0x2ae   : > { %v4212_v15 = vpop.f32.mrf.mxu1 }
 0x2af   : > { %v2846_v0 = vpop.f32.mrf.mxu0  ;;  %v5629_v54 = vadd.f32 %v2830_v32, %v2736_v16 }
 0x2b0   : > { %v2716_v1 = vpop.f32.mrf.mxu1 }
 0x2b1   : > { %v2737_v39 = vadd.f32 %v2716_v1, %v2577_v5  ;;  %v4242_v46 = vpop.f32.mrf.mxu0 }
 0x2b2   : > { %v4215_v21 = vpop.f32.mrf.mxu1 }
 0x2b3   : > { %v3125_v44 = vpop.f32.mrf.mxu0  ;;  %v5631_v25 = vadd.f32 %v2835_v47, %v2737_v39 }
 0x2b4   : > { %v2719_v19 = vpop.f32.mrf.mxu1 }
 0x2b5   : > { %v2738_v17 = vadd.f32 %v2719_v19, %v2578_v61  ;;  %v4269_v60 = vpop.f32.mrf.mxu0 }
 0x2b6   : > { %v4216_v55 = vpop.f32.mrf.mxu1 }
 0x2b7   : > { %v5633_v45 = vpop.f32.mrf.mxu0  ;;  %v5635_v41 = vadd.f32 %v2838_v29, %v2738_v17 }
 0x2b8   : > { %v2724_v8 = vpop.f32.mrf.mxu1 }
 0x2b9   : > { %v2739_v4 = vadd.f32 %v2724_v8, %v2579_v52  ;;  %v4270_v62 = vpop.f32.mrf.mxu0 }
 0x2ba   : > { %v4219_v36 = vpop.f32.mrf.mxu1 }
 0x2bb   : > { %v5637_v38 = vpop.f32.mrf.mxu0  ;;  %v5639_v5 = vadd.f32 %v2843_v22, %v2739_v4 }
 0x2bc   : > { %v2727_v9 = vpop.f32.mrf.mxu1 }
 0x2bd   : > { %v2740_v18 = vadd.f32 %v2727_v9, %v2580_v30  ;;  %v4273_v11 = vpop.f32.mrf.mxu0  ;;  %v5671_v9 = vld [vmem:[%s5737_s5] ss:$0 sm:$0xff] }
 0x2be   : > { %v4220_v24 = vpop.f32.mrf.mxu1 }
 0x2bf   : > { %v5641_v20 = vpop.f32.mrf.mxu0  ;;  %v5643_v61 = vadd.f32 %v2846_v0, %v2740_v18 }
 0x2c0   : > { %v2964_v26 = vpop.f32.mrf.mxu1 }
 0x2c1   : > { %v4274_v7 = vpop.f32.mrf.mxu0  ;;  %v3003_v39 = vadd.f32 %v2964_v26, %v5619_v57 }
 0x2c2   : > { %v4247_v2 = vpop.f32.mrf.mxu1 }
 0x2c3   : > { %v5645_v37 = vpop.f32.mrf.mxu0  ;;  %v3164_v55 = vadd.f32 %v3125_v44, %v3003_v39 }
 0x2c4   : > { %v2967_v52 = vpop.f32.mrf.mxu1 }
 0x2c5   : > { %v4277_v48 = vpop.f32.mrf.mxu0  ;;  %v3004_v60 = vadd.f32 %v2967_v52, %v5621_v56 }
 0x2c6   : > { %v4248_v12 = vpop.f32.mrf.mxu1 }
 0x2c7   : > { %v5647_v63 = vpop.f32.mrf.mxu0  ;;  %v3165_v24 = vadd.f32 %v5633_v45, %v3004_v60 }
 0x2c8   : > { %v2972_v27 = vpop.f32.mrf.mxu1 }
 0x2c9   : > { %v4278_v13 = vpop.f32.mrf.mxu0  ;;  %v3005_v57 = vadd.f32 %v2972_v27, %v5623_v6 }
 0x2ca   : > { %v4251_v53 = vpop.f32.mrf.mxu1 }
 0x2cb   : > { %v5649_v30 = vpop.f32.mrf.mxu0  ;;  %v3166_v45 = vadd.f32 %v5637_v38, %v3005_v57 }
 0x2cc   : > { %v2975_v58 = vpop.f32.mrf.mxu1 }
 0x2cd   : > { %v4281_v32 = vpop.f32.mrf.mxu0  ;;  %v3006_v48 = vadd.f32 %v2975_v58, %v5625_v34 }
 0x2ce   : > { %v4252_v33 = vpop.f32.mrf.mxu1 }
 0x2cf   : > { %v5651_v23 = vpop.f32.mrf.mxu0  ;;  %v3167_v34 = vadd.f32 %v5641_v20, %v3006_v48 }
 0x2d0   : > { %v2980_v28 = vpop.f32.mrf.mxu1 }
 0x2d1   : > { %v4282_v3 = vpop.f32.mrf.mxu0 }
 0x2d2   : > { %v4255_v47 = vpop.f32.mrf.mxu1 }
 0x2d3   : > { %v5653_v51 = vpop.f32.mrf.mxu0  ;;  %v3007_v47 = vadd.f32 %v2980_v28, %v5627_v10 }
 0x2d4   : > { %v2983_v31 = vpop.f32.mrf.mxu1 }
 0x2d5   : > { %v4285_v42 = vpop.f32.mrf.mxu0  ;;  %v3168_v10 = vadd.f32 %v5645_v37, %v3007_v47 }
 0x2d6   : > { %v4256_v14 = vpop.f32.mrf.mxu1 }
 0x2d7   : > { %v5655_v29 = vpop.f32.mrf.mxu0 }
 0x2d8   : > { %v5657_v59 = vpop.f32.mrf.mxu1 }
 0x2d9   : > { %v4286_v40 = vpop.f32.mrf.mxu0 }
 0x2da   : > { %v4259_v43 = vpop.f32.mrf.mxu1 }
 0x2db   : > { %v3381_v49 = vpop.f32.mrf.mxu0 }
 0x2dc   : > { %v5659_v22 = vpop.f32.mrf.mxu1 }
 0x2dd   : > { %v4313_v35 = vpop.f32.mrf.mxu0 }
 0x2de   : > { %v4260_v16 = vpop.f32.mrf.mxu1 }
 0x2df   : > { %v3384_v50 = vpop.f32.mrf.mxu0  ;;  %v3008_v16 = vadd.f32 %v2983_v31, %v5629_v54 }
 0x2e0   : > { %v5661_v15 = vpop.f32.mrf.mxu1 }
 0x2e1   : > { %v4314_v0 = vpop.f32.mrf.mxu0  ;;  %v3169_v31 = vadd.f32 %v5647_v63, %v3008_v16 }
 0x2e2   : > { %v4263_v1 = vpop.f32.mrf.mxu1 }
 0x2e3   : > { %v3389_v46 = vpop.f32.mrf.mxu0 }
 0x2e4   : > { %v5664_v21 = vpop.f32.mrf.mxu1 }
 0x2e5   : > { %v4317_v19 = vpop.f32.mrf.mxu0 }
 0x2e6   : > { %v4264_v17 = vpop.f32.mrf.mxu1 }
 0x2e7   : > { %v3392_v8 = vpop.f32.mrf.mxu0  ;;  %v3009_v17 = vadd.f32 %v5657_v59, %v5631_v25 }
 0x2e8   : > { %v3244_v4 = vpop.f32.mrf.mxu1 }
 0x2e9   : > { %v3283_v62 = vadd.f32 %v3244_v4, %v3164_v55  ;;  %v4318_v36 = vpop.f32.mrf.mxu0  ;;  %v3170_v59 = vadd.f32 %v5649_v30, %v3009_v17 }
 0x2ea   : > { %v4291_v18 = vpop.f32.mrf.mxu1 }
 0x2eb   : > { %v3420_v11 = vadd.f32 %v3381_v49, %v3283_v62  ;;  %v3397_v26 = vpop.f32.mrf.mxu0  ;;  %v3010_v18 = vadd.f32 %v5659_v22, %v5635_v41 }
 0x2ec   : > { %v3247_v7 = vpop.f32.mrf.mxu1 }
 0x2ed   : > { %v3437_v56 = vadd.f32 %v5671_v9, %v3420_v11  ;;  %v3284_v44 = vadd.f32 %v3247_v7, %v3165_v24  ;;  %v4321_v2 = vpop.f32.mrf.mxu0  ;;  %v3171_v22 = vadd.f32 %v5651_v23, %v3010_v18 }
 0x2ee   : > { %v4292_v52 = vpop.f32.mrf.mxu1 }
 0x2ef   : > { %v3447_v12 = vmax.f32 %v3437_v56, 0.0  ;;  %v3421_v6 = vadd.f32 %v3384_v50, %v3284_v44  ;;  %v3400_v27 = vpop.f32.mrf.mxu0  ;;  %v3011_v44 = vadd.f32 %v5661_v15, %v5639_v5 }
 0x2f0   : > { %v3252_v13 = vpop.f32.mrf.mxu1 }
 0x2f1   : > { %3457 = vst.msk [vmem:[%s5679_s22] sm:$0xff] %vm2131_vm9, %v3447_v12  ;;  %v3438_v53 = vadd.f32 %v5671_v9, %v3421_v6  ;;  %v3285_v32 = vadd.f32 %v3252_v13, %v3166_v45  ;;  %v4322_v33 = vpop.f32.mrf.mxu0  ;;  %v3012_v6 = vadd.f32 %v5664_v21, %v5643_v61  ;;  %v3172_v13 = vadd.f32 %v5653_v51, %v3011_v44 }
 0x2f2   : > { %v4295_v3 = vpop.f32.mrf.mxu1 }
 0x2f3   : > { %v3448_v42 = vmax.f32 %v3438_v53, 0.0  ;;  %v3422_v14 = vadd.f32 %v3389_v46, %v3285_v32  ;;  %v3405_v58 = vpop.f32.mrf.mxu0  ;;  %v3173_v3 = vadd.f32 %v5655_v29, %v3012_v6 }
 0x2f4   : > { %v3255_v40 = vpop.f32.mrf.mxu1 }
 0x2f5   : > { %3458 = vst.msk [vmem:[%s5679_s22 + $0x8] sm:$0xff] %vm2131_vm9, %v3448_v42  ;;  %v3439_v38 = vadd.f32 %v5671_v9, %v3422_v14  ;;  %v3286_v43 = vadd.f32 %v3255_v40, %v3167_v34  ;;  %v4325_v49 = vpop.f32.mrf.mxu0 }
 0x2f6   : > { %v4296_v35 = vpop.f32.mrf.mxu1 }
 0x2f7   : > { %v3449_v50 = vmax.f32 %v3439_v38, 0.0  ;;  %v3423_v0 = vadd.f32 %v3392_v8, %v3286_v43  ;;  %v3408_v28 = vpop.f32.mrf.mxu0 }
 0x2f8   : > { %v3260_v1 = vpop.f32.mrf.mxu1 }
 0x2f9   : > { %3459 = vst.msk [vmem:[%s5679_s22 + $0x10] sm:$0xff] %vm2131_vm9, %v3449_v50  ;;  %v3440_v20 = vadd.f32 %v5671_v9, %v3423_v0  ;;  %v3287_v39 = vadd.f32 %v3260_v1, %v3168_v10  ;;  %v4326_v46 = vpop.f32.mrf.mxu0 }
 0x2fa   : > { %v4299_v19 = vpop.f32.mrf.mxu1 }
 0x2fb   : > { %v3450_v60 = vmax.f32 %v3440_v20, 0.0  ;;  %v3424_v54 = vadd.f32 %v3397_v26, %v3287_v39  ;;  %v3413_v55 = vpop.f32.mrf.mxu0 }
 0x2fc   : > { %v3263_v8 = vpop.f32.mrf.mxu1 }
 0x2fd   : > { %3460 = vst.msk [vmem:[%s5679_s22 + $0x18] sm:$0xff] %vm2131_vm9, %v3450_v60  ;;  %v3441_v37 = vadd.f32 %v5671_v9, %v3424_v54  ;;  %v3288_v4 = vadd.f32 %v3263_v8, %v3169_v31  ;;  %v4329_v62 = vpop.f32.mrf.mxu0 }
 0x2fe   : > { %v4300_v36 = vpop.f32.mrf.mxu1 }
 0x2ff   : > { %v3451_v57 = vmax.f32 %v3441_v37, 0.0  ;;  %v3425_v25 = vadd.f32 %v3400_v27, %v3288_v4  ;;  %v3416_v11 = vpop.f32.mrf.mxu0 }
 0x300   : > { %v3268_v24 = vpop.f32.mrf.mxu1 }
 0x301   : > { %3461 = vst.msk [vmem:[%s5679_s22 + $0x20] sm:$0xff] %vm2131_vm9, %v3451_v57  ;;  %v3442_v63 = vadd.f32 %v5671_v9, %v3425_v25  ;;  %v3289_v26 = vadd.f32 %v3268_v24, %v3170_v59  ;;  %v4330_v7 = vpop.f32.mrf.mxu0 }
 0x302   : > { %v4303_v56 = vpop.f32.mrf.mxu1 }
 0x303   : > { %v3452_v2 = vmax.f32 %v3442_v63, 0.0  ;;  %v3426_v41 = vadd.f32 %v3405_v58, %v3289_v26 }
 0x304   : > { %v3271_v52 = vpop.f32.mrf.mxu1 }
 0x305   : > { %3462 = vst.msk [vmem:[%s5679_s22 + $0x28] sm:$0xff] %vm2131_vm9, %v3452_v2  ;;  %v3443_v30 = vadd.f32 %v5671_v9, %v3426_v41  ;;  %v3290_v48 = vadd.f32 %v3271_v52, %v3171_v22 }
 0x306   : > { %v4304_v12 = vpop.f32.mrf.mxu1 }
 0x307   : > { %v3453_v45 = vmax.f32 %v3443_v30, 0.0  ;;  %v3427_v27 = vadd.f32 %v3408_v28, %v3290_v48 }
 0x308   : > { %v3276_v5 = vpop.f32.mrf.mxu1 }
 0x309   : > { %3463 = vst.msk [vmem:[%s5679_s22 + $0x30] sm:$0xff] %vm2131_vm9, %v3453_v45  ;;  %v3444_v23 = vadd.f32 %v5671_v9, %v3427_v27  ;;  %v3291_v15 = vadd.f32 %v3276_v5, %v3172_v13 }
 0x30a   : > { %v4307_v53 = vpop.f32.mrf.mxu1 }
 0x30b   : > { %v3454_v32 = vmax.f32 %v3444_v23, 0.0  ;;  %v3428_v33 = vadd.f32 %v3413_v55, %v3291_v15 }
 0x30c   : > { %v3279_v47 = vpop.f32.mrf.mxu1 }
 0x30d   : > { %3464 = vst.msk [vmem:[%s5679_s22 + $0x38] sm:$0xff] %vm2131_vm9, %v3454_v32  ;;  %v3445_v61 = vadd.f32 %v5671_v9, %v3428_v33  ;;  %v3292_v21 = vadd.f32 %v3279_v47, %v3173_v3 }
 0x30e   : > { %v4308_v51 = vpop.f32.mrf.mxu1 }
 0x30f   : > { %v3455_v42 = vmax.f32 %v3445_v61, 0.0  ;;  %v3429_v14 = vadd.f32 %v3416_v11, %v3292_v21 }
 0x311   : > { %3465 = vst.msk [vmem:[%s5679_s22 + $0x40] sm:$0xff] %vm2131_vm9, %v3455_v42  ;;  %v3446_v34 = vadd.f32 %v5671_v9, %v3429_v14 }
 0x313   : > { %v3456_v58 = vmax.f32 %v3446_v34, 0.0 }
 0x315   : > { %3466 = vst.msk [vmem:[%s5679_s22 + $0x48] sm:$0xff] %vm2131_vm9, %v3456_v58 }
 0x316 PF: > { %s16_s21 = sadd.s32 1, %s4444_s21  }
 0x317   : > { %p13_p4 = scmp.ge.s32.totalorder %s16_s21, 4  }
 0x319   :  { %15 = sbr.rel (!%p13_p4) target bundleno = 1 (0x1), region = 93 }

</bundles_post_ra>
